<compile_context>
chip_gen: v5e
topology: v5e:2x2
jax: 0.10.0
libtpu: 0.0.40
codegen_flags: <defaults>
</compile_context>

<pallas_src>
import functools

import jax
import jax.numpy as jnp
import numpy as np
from jax import lax
from jax.experimental import pallas as pl
from jax.experimental.pallas import tpu as pltpu

# ----------------------------- hyper params --------------------------------
NX = 4        # env.nx
NQ = 2        # args.nq
NU = 1        # env.nu
T = 5         # args.T
HDIM = 32     # args.hdim
DEQ_EXPAND = 4
EXPAND = HDIM * DEQ_EXPAND          # 128
IN_DIM = NX + NX * (T - 1)          # nx*T = 20
OUT_DIM = NX * (T - 1)              # 16
DT = 0.1
DEQ_ITER = 6                        # args.deq_iter (fixed-point steps)
LN_EPS = 1e-5

NP_ROWS = 16                        # packed small-parameter slab rows
OUT_SLAB = 128                      # lane-dense output slab width


def _round_up(a, m):
    return (a + m - 1) // m * m


# ------------------------------ Pallas kernel ------------------------------
def _layernorm(x, gamma, beta):
    mu = jnp.mean(x, axis=-1, keepdims=True)
    var = jnp.mean((x - mu) * (x - mu), axis=-1, keepdims=True)
    return (x - mu) * lax.rsqrt(var + LN_EPS) * gamma + beta


def deq_fused_kernel(
    x_ref,        # (TB, IN_DIM)   flattened x_prev
    z_ref,        # (TB, HDIM)     initial z
    w_in_ref,     # (IN_DIM, HDIM)
    w1_ref,       # (HDIM, EXPAND)
    w2_ref,       # (EXPAND, HDIM)
    w_out_ref,    # (HDIM, OUT_DIM)
    p_ref,        # (NP_ROWS, 128) coalesced biases / LN affines
    out_ref,      # (TB, OUT_SLAB) lane-dense output: [z_out | z_prev | dx | 0]
):
    tb = x_ref.shape[0]

    # --- unpack the coalesced small parameters (single DMA'd slab) ---
    b1, g1, be1 = p_ref[0:1, :], p_ref[1:2, :], p_ref[2:3, :]
    b_in, g_in, be_in = p_ref[3:4, :HDIM], p_ref[4:5, :HDIM], p_ref[5:6, :HDIM]
    b2, g2, be2 = p_ref[6:7, :HDIM], p_ref[7:8, :HDIM], p_ref[8:9, :HDIM]
    g3, be3 = p_ref[9:10, :HDIM], p_ref[10:11, :HDIM]
    b_out = p_ref[11:12, :OUT_DIM]

    w_in = w_in_ref[...]
    w1 = w1_ref[...]
    w2 = w2_ref[...]
    w_out = w_out_ref[...]

    # ---- input_layer: Linear(in_dim, hdim) + LayerNorm(hdim)  (once) ----
    inp = jnp.dot(x_ref[...], w_in, preferred_element_type=jnp.float32) + b_in
    inp = _layernorm(inp, g_in, be_in)

    z0 = z_ref[...]

    # ---- DEQ fixed-point solve: z_{k+1} = deq_layer(inp, z_k), k = 0..deq_iter-1 ----
    def body(_, carry):
        _, zk = carry
        y = jnp.maximum(jnp.dot(zk, w1, preferred_element_type=jnp.float32) + b1, 0.0)
        y = _layernorm(y, g1, be1)
        t = jnp.dot(y, w2, preferred_element_type=jnp.float32) + b2
        t = _layernorm(inp + t, g2, be2)
        z_new = _layernorm(jnp.maximum(zk + t, 0.0), g3, be3)
        return (zk, z_new)

    z_prev, z_out = lax.fori_loop(0, DEQ_ITER, body, (z0, z0), unroll=True)

    # ---- output_layer: Linear(hdim, out_dim) ----
    dx = jnp.dot(z_out, w_out, preferred_element_type=jnp.float32) + b_out

    # ---- lane-dense packed output slab ----
    out_ref[:, 0:HDIM] = z_out
    out_ref[:, HDIM:2 * HDIM] = z_prev
    out_ref[:, 2 * HDIM:2 * HDIM + OUT_DIM] = dx
    out_ref[:, 2 * HDIM + OUT_DIM:] = jnp.zeros(
        (tb, OUT_SLAB - 2 * HDIM - OUT_DIM), jnp.float32)


def _pack_param_slab(p):
    slab = jnp.zeros((NP_ROWS, EXPAND), jnp.float32)
    slab = slab.at[0, :].set(p["b1"].reshape(-1))
    slab = slab.at[1, :].set(p["g1"].reshape(-1))
    slab = slab.at[2, :].set(p["be1"].reshape(-1))
    slab = slab.at[3, :HDIM].set(p["b_in"].reshape(-1))
    slab = slab.at[4, :HDIM].set(p["g_in"].reshape(-1))
    slab = slab.at[5, :HDIM].set(p["be_in"].reshape(-1))
    slab = slab.at[6, :HDIM].set(p["b2"].reshape(-1))
    slab = slab.at[7, :HDIM].set(p["g2"].reshape(-1))
    slab = slab.at[8, :HDIM].set(p["be2"].reshape(-1))
    slab = slab.at[9, :HDIM].set(p["g3"].reshape(-1))
    slab = slab.at[10, :HDIM].set(p["be3"].reshape(-1))
    slab = slab.at[11, :OUT_DIM].set(p["b_out"].reshape(-1))
    return slab


def fused_deq_forward(x_flat, z0, params):
    """Runs input_layer + DEQ_ITER fixed-point iterations + output_layer fused."""
    bsz = x_flat.shape[0]
    # Batch tile: >=128 rows for large batches (fills the MXU M dim, gives the
    # pipeline work to overlap, and keeps per-tile VMEM small on v7x);
    # otherwise a single padded-to-8 tile.
    tb = 128 if bsz > 128 else _round_up(bsz, 8)
    b_pad = _round_up(bsz, tb)
    if b_pad != bsz:
        x_flat = jnp.pad(x_flat, ((0, b_pad - bsz), (0, 0)))
        z0 = jnp.pad(z0, ((0, b_pad - bsz), (0, 0)))

    pslab = _pack_param_slab(params)
    grid = (b_pad // tb,)

    out = pl.pallas_call(
        deq_fused_kernel,
        out_shape=jax.ShapeDtypeStruct((b_pad, OUT_SLAB), jnp.float32),
        grid=grid,
        in_specs=[
            pl.BlockSpec((tb, IN_DIM), lambda i: (i, 0)),       # x_flat (per tile)
            pl.BlockSpec((tb, HDIM), lambda i: (i, 0)),         # z0     (per tile)
            pl.BlockSpec((IN_DIM, HDIM), lambda i: (0, 0)),     # w_in   (resident)
            pl.BlockSpec((HDIM, EXPAND), lambda i: (0, 0)),     # w1     (resident)
            pl.BlockSpec((EXPAND, HDIM), lambda i: (0, 0)),     # w2     (resident)
            pl.BlockSpec((HDIM, OUT_DIM), lambda i: (0, 0)),    # w_out  (resident)
            pl.BlockSpec((NP_ROWS, EXPAND), lambda i: (0, 0)),  # param slab (resident)
        ],
        out_specs=pl.BlockSpec((tb, OUT_SLAB), lambda i: (i, 0)),
        compiler_params=pltpu.CompilerParams(
            dimension_semantics=("parallel",)),
    )(x_flat, z0, params["w_in"], params["w1"], params["w2"],
      params["w_out"], pslab)

    z_out = out[:bsz, 0:HDIM]
    z_prev = out[:bsz, HDIM:2 * HDIM]
    dx = out[:bsz, 2 * HDIM:2 * HDIM + OUT_DIM]
    return z_out, z_prev, dx


# ----------------------------- module wrapper -------------------------------
def init_params(key):
    """Deterministic synthetic parameters matching the module's shapes."""
    ks = jax.random.split(key, 8)
    p = {
        # input_layer: Linear(IN_DIM, HDIM) + LayerNorm(HDIM)
        "w_in": jax.random.normal(ks[0], (IN_DIM, HDIM), jnp.float32) * 0.1,
        "b_in": jax.random.normal(ks[1], (1, HDIM), jnp.float32) * 0.01,
        "g_in": jnp.ones((1, HDIM), jnp.float32),
        "be_in": jnp.zeros((1, HDIM), jnp.float32),
        # fcdeq1: Linear(HDIM, EXPAND) + lndeq1
        "w1": jax.random.normal(ks[2], (HDIM, EXPAND), jnp.float32) * 0.1,
        "b1": jax.random.normal(ks[3], (1, EXPAND), jnp.float32) * 0.01,
        "g1": jnp.ones((1, EXPAND), jnp.float32),
        "be1": jnp.zeros((1, EXPAND), jnp.float32),
        # fcdeq2: Linear(EXPAND, HDIM) + lndeq2
        "w2": jax.random.normal(ks[4], (EXPAND, HDIM), jnp.float32) * 0.1,
        "b2": jax.random.normal(ks[5], (1, HDIM), jnp.float32) * 0.01,
        "g2": jnp.ones((1, HDIM), jnp.float32),
        "be2": jnp.zeros((1, HDIM), jnp.float32),
        # lndeq3
        "g3": jnp.ones((1, HDIM), jnp.float32),
        "be3": jnp.zeros((1, HDIM), jnp.float32),
        # out_layer: Linear(HDIM, OUT_DIM)
        "w_out": jax.random.normal(ks[6], (HDIM, OUT_DIM), jnp.float32) * 0.1,
        "b_out": jax.random.normal(ks[7], (1, OUT_DIM), jnp.float32) * 0.01,
        # embedding_params exist on the module; the shown forward multiplies
        # them by 0 for the mlp input layer and their use inside
        # DEQFixedPointLayer is not specified -> kept for shape fidelity only.
        "embedding_params": jnp.zeros((DEQ_ITER, HDIM), jnp.float32),
    }
    return p


@jax.jit
def deq_layer_forward(obs, x_prev, z, params, iter_idx):
    """Forward pass of DEQLayer (mlp branch).

    obs:    (bsz, NX)
    x_prev: (bsz, T, NX)
    z:      (bsz, HDIM)
    """
    bsz = obs.shape[0]
    _obs = obs.reshape(bsz, 1, NX)
    x_flat = x_prev.reshape(bsz, -1)                                  # (bsz, T*NX)

    # fused hot path: input layer + DEQ fixed-point solve + output layer
    z_out, z_prev, dx = fused_deq_forward(x_flat, z, params)

    # TODO(synk): DEQFixedPointLayer is not provided; the solver is modeled as
    # deq_iter plain fixed-point iterations and its logs are approximated here
    # (rel err from the last two iterates, jac_loss = 0).
    fwd_rel_err = jnp.linalg.norm(z_out - z_prev) / (jnp.linalg.norm(z_out) + 1e-8)
    fwd_steps = jnp.float32(DEQ_ITER)
    jac_loss = jnp.float32(0.0)

    # glue: reconstruct x_ref / u_ref exactly as the module does
    dx_ref = dx.reshape(bsz, T - 1, NX)
    vel_ref = dx_ref[..., NQ:]
    pos_ref = dx_ref[..., :NQ] * DT
    x_ref_body = jnp.concatenate(
        [pos_ref + x_prev[:, :1, :NQ], vel_ref], axis=-1)             # (bsz, T-1, NX)
    x_ref = jnp.concatenate([_obs, x_ref_body], axis=1)               # (bsz, T, NX)
    u_ref = jnp.zeros_like(x_ref[..., :NU])                           # (bsz, T, NU)

    out_mpc_dict = {"x_t": obs, "x_ref": x_ref, "u_ref": u_ref}
    out_aux_dict = {"x": x_ref, "u": u_ref, "z": z_out, "iter": iter_idx,
                    "deq_fwd_err": fwd_rel_err, "deq_fwd_steps": fwd_steps,
                    "jac_loss": jac_loss}
    return out_mpc_dict, out_aux_dict


# --------------------------- pure-JAX reference -----------------------------
_HI = jax.lax.Precision.HIGHEST


def _ref_layernorm(x, g, b):
    mu = x.mean(-1, keepdims=True)
    var = ((x - mu) ** 2).mean(-1, keepdims=True)
    return (x - mu) / jnp.sqrt(var + LN_EPS) * g + b


def reference_forward(obs, x_prev, z, p):
    bsz = obs.shape[0]
    x_flat = x_prev.reshape(bsz, -1)
    inp = _ref_layernorm(jnp.dot(x_flat, p["w_in"], precision=_HI) + p["b_in"],
                         p["g_in"], p["be_in"])
    zk = z
    for _ in range(DEQ_ITER):
        y = _ref_layernorm(
            jnp.maximum(jnp.dot(zk, p["w1"], precision=_HI) + p["b1"], 0.0),
            p["g1"], p["be1"])
        t = _ref_layernorm(inp + jnp.dot(y, p["w2"], precision=_HI) + p["b2"],
                           p["g2"], p["be2"])
        zk = _ref_layernorm(jnp.maximum(zk + t, 0.0), p["g3"], p["be3"])
    dx = jnp.dot(zk, p["w_out"], precision=_HI) + p["b_out"]
    dx = dx.reshape(bsz, T - 1, NX)
    vel = dx[..., NQ:]
    pos = dx[..., :NQ] * DT
    body = jnp.concatenate([pos + x_prev[:, :1, :NQ], vel], -1)
    x_ref = jnp.concatenate([obs.reshape(bsz, 1, NX), body], 1)
    return x_ref, zk


# ---------------------------------- main ------------------------------------
if __name__ == "__main__":
    key = jax.random.PRNGKey(0)
    kp, ko, kx, kz = jax.random.split(key, 4)

    params = init_params(kp)

    bsz = 2
    obs = jax.random.normal(ko, (bsz, NX), jnp.float32)
    x_prev = jax.random.normal(kx, (bsz, T, NX), jnp.float32)
    z = jax.random.normal(kz, (bsz, HDIM), jnp.float32)
    iter_idx = jnp.int32(1)

    out_mpc, out_aux = deq_layer_forward(obs, x_prev, z, params, iter_idx)
    jax.block_until_ready(out_mpc["x_ref"])
    jax.block_until_ready(out_aux["z"])

    # correctness check against a pure-JAX reference
    x_ref_ref, z_out_ref = reference_forward(obs, x_prev, z, params)
    np.testing.assert_allclose(np.asarray(out_mpc["x_ref"]), np.asarray(x_ref_ref),
                               rtol=1e-4, atol=1e-4)
    np.testing.assert_allclose(np.asarray(out_aux["z"]), np.asarray(z_out_ref),
                               rtol=1e-4, atol=1e-4)

    # shape / value sanity
    assert out_mpc["x_ref"].shape == (bsz, T, NX)
    assert out_mpc["u_ref"].shape == (bsz, T, NU)
    assert out_aux["z"].shape == (bsz, HDIM)
    assert np.isfinite(float(out_aux["deq_fwd_err"]))

    # TODO(synk): GradNormLayer / ScaleMultiplyLayer definitions are not given;
    # neither appears in the mlp forward path shown, so nothing is modeled for them.
    print("KERNEL_OK")
</pallas_src>

<mosaic_0001>
module attributes {stable_mosaic.version = 11 : i64} {
  func.func @deq_fused_kernel(%arg0: i32, %arg1: memref<8x20xf32, #tpu.memory_space<vmem>>, %arg2: memref<8x32xf32, #tpu.memory_space<vmem>>, %arg3: memref<20x32xf32, #tpu.memory_space<vmem>>, %arg4: memref<32x128xf32, #tpu.memory_space<vmem>>, %arg5: memref<128x32xf32, #tpu.memory_space<vmem>>, %arg6: memref<32x16xf32, #tpu.memory_space<vmem>>, %arg7: memref<16x128xf32, #tpu.memory_space<vmem>>, %arg8: memref<8x128xf32, #tpu.memory_space<vmem>>) attributes {dimension_semantics = [#tpu.dimension_semantics<parallel>], iteration_bounds = array<i64: 1>, scalar_prefetch = 0 : i64, scratch_operands = 0 : i64, tpu.core_type = #tpu.core_type<tc>, window_params = [{transform_indices = @transform_0, window_bounds = array<i64: 8, 20>}, {transform_indices = @transform_1, window_bounds = array<i64: 8, 32>}, {pipeline_mode = #tpu.pipeline_mode<synchronous>, transform_indices = @transform_2, window_bounds = array<i64: 20, 32>}, {pipeline_mode = #tpu.pipeline_mode<synchronous>, transform_indices = @transform_3, window_bounds = array<i64: 32, 128>}, {pipeline_mode = #tpu.pipeline_mode<synchronous>, transform_indices = @transform_4, window_bounds = array<i64: 128, 32>}, {pipeline_mode = #tpu.pipeline_mode<synchronous>, transform_indices = @transform_5, window_bounds = array<i64: 32, 16>}, {pipeline_mode = #tpu.pipeline_mode<synchronous>, transform_indices = @transform_6, window_bounds = array<i64: 16, 128>}, {transform_indices = @transform_7, window_bounds = array<i64: 8, 128>}]} {
    %c0 = arith.constant 0 : index
    %c0_0 = arith.constant 0 : index
    %0 = vector.load %arg7[%c0, %c0_0] : memref<16x128xf32, #tpu.memory_space<vmem>>, vector<1x128xf32>
    %c1 = arith.constant 1 : index
    %c0_1 = arith.constant 0 : index
    %1 = vector.load %arg7[%c1, %c0_1] : memref<16x128xf32, #tpu.memory_space<vmem>>, vector<1x128xf32>
    %c2 = arith.constant 2 : index
    %c0_2 = arith.constant 0 : index
    %2 = vector.load %arg7[%c2, %c0_2] : memref<16x128xf32, #tpu.memory_space<vmem>>, vector<1x128xf32>
    %c3 = arith.constant 3 : index
    %c0_3 = arith.constant 0 : index
    %3 = vector.load %arg7[%c3, %c0_3] : memref<16x128xf32, #tpu.memory_space<vmem>>, vector<1x32xf32>
    %c4 = arith.constant 4 : index
    %c0_4 = arith.constant 0 : index
    %4 = vector.load %arg7[%c4, %c0_4] : memref<16x128xf32, #tpu.memory_space<vmem>>, vector<1x32xf32>
    %c5 = arith.constant 5 : index
    %c0_5 = arith.constant 0 : index
    %5 = vector.load %arg7[%c5, %c0_5] : memref<16x128xf32, #tpu.memory_space<vmem>>, vector<1x32xf32>
    %c6 = arith.constant 6 : index
    %c0_6 = arith.constant 0 : index
    %6 = vector.load %arg7[%c6, %c0_6] : memref<16x128xf32, #tpu.memory_space<vmem>>, vector<1x32xf32>
    %c7 = arith.constant 7 : index
    %c0_7 = arith.constant 0 : index
    %7 = vector.load %arg7[%c7, %c0_7] : memref<16x128xf32, #tpu.memory_space<vmem>>, vector<1x32xf32>
    %c8 = arith.constant 8 : index
    %c0_8 = arith.constant 0 : index
    %8 = vector.load %arg7[%c8, %c0_8] : memref<16x128xf32, #tpu.memory_space<vmem>>, vector<1x32xf32>
    %c9 = arith.constant 9 : index
    %c0_9 = arith.constant 0 : index
    %9 = vector.load %arg7[%c9, %c0_9] : memref<16x128xf32, #tpu.memory_space<vmem>>, vector<1x32xf32>
    %c10 = arith.constant 10 : index
    %c0_10 = arith.constant 0 : index
    %10 = vector.load %arg7[%c10, %c0_10] : memref<16x128xf32, #tpu.memory_space<vmem>>, vector<1x32xf32>
    %c11 = arith.constant 11 : index
    %c0_11 = arith.constant 0 : index
    %11 = vector.load %arg7[%c11, %c0_11] : memref<16x128xf32, #tpu.memory_space<vmem>>, vector<1x16xf32>
    %c0_12 = arith.constant 0 : index
    %c0_13 = arith.constant 0 : index
    %12 = vector.load %arg3[%c0_12, %c0_13] : memref<20x32xf32, #tpu.memory_space<vmem>>, vector<20x32xf32>
    %c0_14 = arith.constant 0 : index
    %c0_15 = arith.constant 0 : index
    %13 = vector.load %arg4[%c0_14, %c0_15] : memref<32x128xf32, #tpu.memory_space<vmem>>, vector<32x128xf32>
    %c0_16 = arith.constant 0 : index
    %c0_17 = arith.constant 0 : index
    %14 = vector.load %arg5[%c0_16, %c0_17] : memref<128x32xf32, #tpu.memory_space<vmem>>, vector<128x32xf32>
    %c0_18 = arith.constant 0 : index
    %c0_19 = arith.constant 0 : index
    %15 = vector.load %arg6[%c0_18, %c0_19] : memref<32x16xf32, #tpu.memory_space<vmem>>, vector<32x16xf32>
    %c0_20 = arith.constant 0 : index
    %c0_21 = arith.constant 0 : index
    %16 = vector.load %arg1[%c0_20, %c0_21] : memref<8x20xf32, #tpu.memory_space<vmem>>, vector<8x20xf32>
    %cst = arith.constant dense<0.000000e+00> : vector<8x32xf32>
    %17 = tpu.matmul %16, %12, %cst {dimension_numbers = #tpu.dot_dimension_numbers<[1], [0], [0], [1], [0, 0, 1, 1], [], []>} : vector<8x20xf32>, vector<20x32xf32>, vector<8x32xf32> -> vector<8x32xf32>
    %18 = vector.broadcast %3 : vector<1x32xf32> to vector<8x32xf32>
    %19 = arith.addf %17, %18 : vector<8x32xf32>
    %cst_22 = arith.constant dense<0.000000e+00> : vector<8xf32>
    %20 = vector.multi_reduction <add>, %19, %cst_22 [1] : vector<8x32xf32> to vector<8xf32>
    %21 = vector.shape_cast %20 : vector<8xf32> to vector<8x1xf32>
    %cst_23 = arith.constant 3.200000e+01 : f32
    %22 = vector.broadcast %cst_23 : f32 to vector<8x1xf32>
    %23 = arith.divf %21, %22 : vector<8x1xf32>
    %24 = vector.broadcast %23 : vector<8x1xf32> to vector<8x32xf32>
    %25 = arith.subf %19, %24 : vector<8x32xf32>
    %26 = vector.broadcast %23 : vector<8x1xf32> to vector<8x32xf32>
    %27 = arith.subf %19, %26 : vector<8x32xf32>
    %28 = arith.mulf %25, %27 : vector<8x32xf32>
    %cst_24 = arith.constant dense<0.000000e+00> : vector<8xf32>
    %29 = vector.multi_reduction <add>, %28, %cst_24 [1] : vector<8x32xf32> to vector<8xf32>
    %30 = vector.shape_cast %29 : vector<8xf32> to vector<8x1xf32>
    %cst_25 = arith.constant 3.200000e+01 : f32
    %31 = vector.broadcast %cst_25 : f32 to vector<8x1xf32>
    %32 = arith.divf %30, %31 : vector<8x1xf32>
    %33 = vector.broadcast %23 : vector<8x1xf32> to vector<8x32xf32>
    %34 = arith.subf %19, %33 : vector<8x32xf32>
    %cst_26 = arith.constant 9.99999974E-6 : f32
    %35 = vector.broadcast %cst_26 : f32 to vector<8x1xf32>
    %36 = arith.addf %32, %35 : vector<8x1xf32>
    %37 = math.rsqrt %36 : vector<8x1xf32>
    %38 = vector.broadcast %37 : vector<8x1xf32> to vector<8x32xf32>
    %39 = arith.mulf %34, %38 : vector<8x32xf32>
    %40 = vector.broadcast %4 : vector<1x32xf32> to vector<8x32xf32>
    %41 = arith.mulf %39, %40 : vector<8x32xf32>
    %42 = vector.broadcast %5 : vector<1x32xf32> to vector<8x32xf32>
    %43 = arith.addf %41, %42 : vector<8x32xf32>
    %c0_27 = arith.constant 0 : index
    %c0_28 = arith.constant 0 : index
    %44 = vector.load %arg2[%c0_27, %c0_28] : memref<8x32xf32, #tpu.memory_space<vmem>>, vector<8x32xf32>
    %c0_i32 = arith.constant 0 : i32
    %cst_29 = arith.constant dense<0.000000e+00> : vector<8x128xf32>
    %45 = tpu.matmul %44, %13, %cst_29 {dimension_numbers = #tpu.dot_dimension_numbers<[1], [0], [0], [1], [0, 0, 1, 1], [], []>} : vector<8x32xf32>, vector<32x128xf32>, vector<8x128xf32> -> vector<8x128xf32>
    %46 = vector.broadcast %0 : vector<1x128xf32> to vector<8x128xf32>
    %47 = arith.addf %45, %46 : vector<8x128xf32>
    %cst_30 = arith.constant 0.000000e+00 : f32
    %48 = vector.broadcast %cst_30 : f32 to vector<8x128xf32>
    %49 = arith.maximumf %47, %48 : vector<8x128xf32>
    %cst_31 = arith.constant dense<0.000000e+00> : vector<8xf32>
    %50 = vector.multi_reduction <add>, %49, %cst_31 [1] : vector<8x128xf32> to vector<8xf32>
    %51 = vector.shape_cast %50 : vector<8xf32> to vector<8x1xf32>
    %cst_32 = arith.constant 1.280000e+02 : f32
    %52 = vector.broadcast %cst_32 : f32 to vector<8x1xf32>
    %53 = arith.divf %51, %52 : vector<8x1xf32>
    %54 = vector.broadcast %53 : vector<8x1xf32> to vector<8x128xf32>
    %55 = arith.subf %49, %54 : vector<8x128xf32>
    %56 = vector.broadcast %53 : vector<8x1xf32> to vector<8x128xf32>
    %57 = arith.subf %49, %56 : vector<8x128xf32>
    %58 = arith.mulf %55, %57 : vector<8x128xf32>
    %cst_33 = arith.constant dense<0.000000e+00> : vector<8xf32>
    %59 = vector.multi_reduction <add>, %58, %cst_33 [1] : vector<8x128xf32> to vector<8xf32>
    %60 = vector.shape_cast %59 : vector<8xf32> to vector<8x1xf32>
    %cst_34 = arith.constant 1.280000e+02 : f32
    %61 = vector.broadcast %cst_34 : f32 to vector<8x1xf32>
    %62 = arith.divf %60, %61 : vector<8x1xf32>
    %63 = vector.broadcast %53 : vector<8x1xf32> to vector<8x128xf32>
    %64 = arith.subf %49, %63 : vector<8x128xf32>
    %cst_35 = arith.constant 9.99999974E-6 : f32
    %65 = vector.broadcast %cst_35 : f32 to vector<8x1xf32>
    %66 = arith.addf %62, %65 : vector<8x1xf32>
    %67 = math.rsqrt %66 : vector<8x1xf32>
    %68 = vector.broadcast %67 : vector<8x1xf32> to vector<8x128xf32>
    %69 = arith.mulf %64, %68 : vector<8x128xf32>
    %70 = vector.broadcast %1 : vector<1x128xf32> to vector<8x128xf32>
    %71 = arith.mulf %69, %70 : vector<8x128xf32>
    %72 = vector.broadcast %2 : vector<1x128xf32> to vector<8x128xf32>
    %73 = arith.addf %71, %72 : vector<8x128xf32>
    %cst_36 = arith.constant dense<0.000000e+00> : vector<8x32xf32>
    %74 = tpu.matmul %73, %14, %cst_36 {dimension_numbers = #tpu.dot_dimension_numbers<[1], [0], [0], [1], [0, 0, 1, 1], [], []>} : vector<8x128xf32>, vector<128x32xf32>, vector<8x32xf32> -> vector<8x32xf32>
    %75 = vector.broadcast %6 : vector<1x32xf32> to vector<8x32xf32>
    %76 = arith.addf %74, %75 : vector<8x32xf32>
    %77 = arith.addf %43, %76 : vector<8x32xf32>
    %cst_37 = arith.constant dense<0.000000e+00> : vector<8xf32>
    %78 = vector.multi_reduction <add>, %77, %cst_37 [1] : vector<8x32xf32> to vector<8xf32>
    %79 = vector.shape_cast %78 : vector<8xf32> to vector<8x1xf32>
    %cst_38 = arith.constant 3.200000e+01 : f32
    %80 = vector.broadcast %cst_38 : f32 to vector<8x1xf32>
    %81 = arith.divf %79, %80 : vector<8x1xf32>
    %82 = vector.broadcast %81 : vector<8x1xf32> to vector<8x32xf32>
    %83 = arith.subf %77, %82 : vector<8x32xf32>
    %84 = vector.broadcast %81 : vector<8x1xf32> to vector<8x32xf32>
    %85 = arith.subf %77, %84 : vector<8x32xf32>
    %86 = arith.mulf %83, %85 : vector<8x32xf32>
    %cst_39 = arith.constant dense<0.000000e+00> : vector<8xf32>
    %87 = vector.multi_reduction <add>, %86, %cst_39 [1] : vector<8x32xf32> to vector<8xf32>
    %88 = vector.shape_cast %87 : vector<8xf32> to vector<8x1xf32>
    %cst_40 = arith.constant 3.200000e+01 : f32
    %89 = vector.broadcast %cst_40 : f32 to vector<8x1xf32>
    %90 = arith.divf %88, %89 : vector<8x1xf32>
    %91 = vector.broadcast %81 : vector<8x1xf32> to vector<8x32xf32>
    %92 = arith.subf %77, %91 : vector<8x32xf32>
    %cst_41 = arith.constant 9.99999974E-6 : f32
    %93 = vector.broadcast %cst_41 : f32 to vector<8x1xf32>
    %94 = arith.addf %90, %93 : vector<8x1xf32>
    %95 = math.rsqrt %94 : vector<8x1xf32>
    %96 = vector.broadcast %95 : vector<8x1xf32> to vector<8x32xf32>
    %97 = arith.mulf %92, %96 : vector<8x32xf32>
    %98 = vector.broadcast %7 : vector<1x32xf32> to vector<8x32xf32>
    %99 = arith.mulf %97, %98 : vector<8x32xf32>
    %100 = vector.broadcast %8 : vector<1x32xf32> to vector<8x32xf32>
    %101 = arith.addf %99, %100 : vector<8x32xf32>
    %102 = arith.addf %44, %101 : vector<8x32xf32>
    %cst_42 = arith.constant 0.000000e+00 : f32
    %103 = vector.broadcast %cst_42 : f32 to vector<8x32xf32>
    %104 = arith.maximumf %102, %103 : vector<8x32xf32>
    %cst_43 = arith.constant dense<0.000000e+00> : vector<8xf32>
    %105 = vector.multi_reduction <add>, %104, %cst_43 [1] : vector<8x32xf32> to vector<8xf32>
    %106 = vector.shape_cast %105 : vector<8xf32> to vector<8x1xf32>
    %cst_44 = arith.constant 3.200000e+01 : f32
    %107 = vector.broadcast %cst_44 : f32 to vector<8x1xf32>
    %108 = arith.divf %106, %107 : vector<8x1xf32>
    %109 = vector.broadcast %108 : vector<8x1xf32> to vector<8x32xf32>
    %110 = arith.subf %104, %109 : vector<8x32xf32>
    %111 = vector.broadcast %108 : vector<8x1xf32> to vector<8x32xf32>
    %112 = arith.subf %104, %111 : vector<8x32xf32>
    %113 = arith.mulf %110, %112 : vector<8x32xf32>
    %cst_45 = arith.constant dense<0.000000e+00> : vector<8xf32>
    %114 = vector.multi_reduction <add>, %113, %cst_45 [1] : vector<8x32xf32> to vector<8xf32>
    %115 = vector.shape_cast %114 : vector<8xf32> to vector<8x1xf32>
    %cst_46 = arith.constant 3.200000e+01 : f32
    %116 = vector.broadcast %cst_46 : f32 to vector<8x1xf32>
    %117 = arith.divf %115, %116 : vector<8x1xf32>
    %118 = vector.broadcast %108 : vector<8x1xf32> to vector<8x32xf32>
    %119 = arith.subf %104, %118 : vector<8x32xf32>
    %cst_47 = arith.constant 9.99999974E-6 : f32
    %120 = vector.broadcast %cst_47 : f32 to vector<8x1xf32>
    %121 = arith.addf %117, %120 : vector<8x1xf32>
    %122 = math.rsqrt %121 : vector<8x1xf32>
    %123 = vector.broadcast %122 : vector<8x1xf32> to vector<8x32xf32>
    %124 = arith.mulf %119, %123 : vector<8x32xf32>
    %125 = vector.broadcast %9 : vector<1x32xf32> to vector<8x32xf32>
    %126 = arith.mulf %124, %125 : vector<8x32xf32>
    %127 = vector.broadcast %10 : vector<1x32xf32> to vector<8x32xf32>
    %128 = arith.addf %126, %127 : vector<8x32xf32>
    %c1_i32 = arith.constant 1 : i32
    %cst_48 = arith.constant dense<0.000000e+00> : vector<8x128xf32>
    %129 = tpu.matmul %128, %13, %cst_48 {dimension_numbers = #tpu.dot_dimension_numbers<[1], [0], [0], [1], [0, 0, 1, 1], [], []>} : vector<8x32xf32>, vector<32x128xf32>, vector<8x128xf32> -> vector<8x128xf32>
    %130 = vector.broadcast %0 : vector<1x128xf32> to vector<8x128xf32>
    %131 = arith.addf %129, %130 : vector<8x128xf32>
    %cst_49 = arith.constant 0.000000e+00 : f32
    %132 = vector.broadcast %cst_49 : f32 to vector<8x128xf32>
    %133 = arith.maximumf %131, %132 : vector<8x128xf32>
    %cst_50 = arith.constant dense<0.000000e+00> : vector<8xf32>
    %134 = vector.multi_reduction <add>, %133, %cst_50 [1] : vector<8x128xf32> to vector<8xf32>
    %135 = vector.shape_cast %134 : vector<8xf32> to vector<8x1xf32>
    %cst_51 = arith.constant 1.280000e+02 : f32
    %136 = vector.broadcast %cst_51 : f32 to vector<8x1xf32>
    %137 = arith.divf %135, %136 : vector<8x1xf32>
    %138 = vector.broadcast %137 : vector<8x1xf32> to vector<8x128xf32>
    %139 = arith.subf %133, %138 : vector<8x128xf32>
    %140 = vector.broadcast %137 : vector<8x1xf32> to vector<8x128xf32>
    %141 = arith.subf %133, %140 : vector<8x128xf32>
    %142 = arith.mulf %139, %141 : vector<8x128xf32>
    %cst_52 = arith.constant dense<0.000000e+00> : vector<8xf32>
    %143 = vector.multi_reduction <add>, %142, %cst_52 [1] : vector<8x128xf32> to vector<8xf32>
    %144 = vector.shape_cast %143 : vector<8xf32> to vector<8x1xf32>
    %cst_53 = arith.constant 1.280000e+02 : f32
    %145 = vector.broadcast %cst_53 : f32 to vector<8x1xf32>
    %146 = arith.divf %144, %145 : vector<8x1xf32>
    %147 = vector.broadcast %137 : vector<8x1xf32> to vector<8x128xf32>
    %148 = arith.subf %133, %147 : vector<8x128xf32>
    %cst_54 = arith.constant 9.99999974E-6 : f32
    %149 = vector.broadcast %cst_54 : f32 to vector<8x1xf32>
    %150 = arith.addf %146, %149 : vector<8x1xf32>
    %151 = math.rsqrt %150 : vector<8x1xf32>
    %152 = vector.broadcast %151 : vector<8x1xf32> to vector<8x128xf32>
    %153 = arith.mulf %148, %152 : vector<8x128xf32>
    %154 = vector.broadcast %1 : vector<1x128xf32> to vector<8x128xf32>
    %155 = arith.mulf %153, %154 : vector<8x128xf32>
    %156 = vector.broadcast %2 : vector<1x128xf32> to vector<8x128xf32>
    %157 = arith.addf %155, %156 : vector<8x128xf32>
    %cst_55 = arith.constant dense<0.000000e+00> : vector<8x32xf32>
    %158 = tpu.matmul %157, %14, %cst_55 {dimension_numbers = #tpu.dot_dimension_numbers<[1], [0], [0], [1], [0, 0, 1, 1], [], []>} : vector<8x128xf32>, vector<128x32xf32>, vector<8x32xf32> -> vector<8x32xf32>
    %159 = vector.broadcast %6 : vector<1x32xf32> to vector<8x32xf32>
    %160 = arith.addf %158, %159 : vector<8x32xf32>
    %161 = arith.addf %43, %160 : vector<8x32xf32>
    %cst_56 = arith.constant dense<0.000000e+00> : vector<8xf32>
    %162 = vector.multi_reduction <add>, %161, %cst_56 [1] : vector<8x32xf32> to vector<8xf32>
    %163 = vector.shape_cast %162 : vector<8xf32> to vector<8x1xf32>
    %cst_57 = arith.constant 3.200000e+01 : f32
    %164 = vector.broadcast %cst_57 : f32 to vector<8x1xf32>
    %165 = arith.divf %163, %164 : vector<8x1xf32>
    %166 = vector.broadcast %165 : vector<8x1xf32> to vector<8x32xf32>
    %167 = arith.subf %161, %166 : vector<8x32xf32>
    %168 = vector.broadcast %165 : vector<8x1xf32> to vector<8x32xf32>
    %169 = arith.subf %161, %168 : vector<8x32xf32>
    %170 = arith.mulf %167, %169 : vector<8x32xf32>
    %cst_58 = arith.constant dense<0.000000e+00> : vector<8xf32>
    %171 = vector.multi_reduction <add>, %170, %cst_58 [1] : vector<8x32xf32> to vector<8xf32>
    %172 = vector.shape_cast %171 : vector<8xf32> to vector<8x1xf32>
    %cst_59 = arith.constant 3.200000e+01 : f32
    %173 = vector.broadcast %cst_59 : f32 to vector<8x1xf32>
    %174 = arith.divf %172, %173 : vector<8x1xf32>
    %175 = vector.broadcast %165 : vector<8x1xf32> to vector<8x32xf32>
    %176 = arith.subf %161, %175 : vector<8x32xf32>
    %cst_60 = arith.constant 9.99999974E-6 : f32
    %177 = vector.broadcast %cst_60 : f32 to vector<8x1xf32>
    %178 = arith.addf %174, %177 : vector<8x1xf32>
    %179 = math.rsqrt %178 : vector<8x1xf32>
    %180 = vector.broadcast %179 : vector<8x1xf32> to vector<8x32xf32>
    %181 = arith.mulf %176, %180 : vector<8x32xf32>
    %182 = vector.broadcast %7 : vector<1x32xf32> to vector<8x32xf32>
    %183 = arith.mulf %181, %182 : vector<8x32xf32>
    %184 = vector.broadcast %8 : vector<1x32xf32> to vector<8x32xf32>
    %185 = arith.addf %183, %184 : vector<8x32xf32>
    %186 = arith.addf %128, %185 : vector<8x32xf32>
    %cst_61 = arith.constant 0.000000e+00 : f32
    %187 = vector.broadcast %cst_61 : f32 to vector<8x32xf32>
    %188 = arith.maximumf %186, %187 : vector<8x32xf32>
    %cst_62 = arith.constant dense<0.000000e+00> : vector<8xf32>
    %189 = vector.multi_reduction <add>, %188, %cst_62 [1] : vector<8x32xf32> to vector<8xf32>
    %190 = vector.shape_cast %189 : vector<8xf32> to vector<8x1xf32>
    %cst_63 = arith.constant 3.200000e+01 : f32
    %191 = vector.broadcast %cst_63 : f32 to vector<8x1xf32>
    %192 = arith.divf %190, %191 : vector<8x1xf32>
    %193 = vector.broadcast %192 : vector<8x1xf32> to vector<8x32xf32>
    %194 = arith.subf %188, %193 : vector<8x32xf32>
    %195 = vector.broadcast %192 : vector<8x1xf32> to vector<8x32xf32>
    %196 = arith.subf %188, %195 : vector<8x32xf32>
    %197 = arith.mulf %194, %196 : vector<8x32xf32>
    %cst_64 = arith.constant dense<0.000000e+00> : vector<8xf32>
    %198 = vector.multi_reduction <add>, %197, %cst_64 [1] : vector<8x32xf32> to vector<8xf32>
    %199 = vector.shape_cast %198 : vector<8xf32> to vector<8x1xf32>
    %cst_65 = arith.constant 3.200000e+01 : f32
    %200 = vector.broadcast %cst_65 : f32 to vector<8x1xf32>
    %201 = arith.divf %199, %200 : vector<8x1xf32>
    %202 = vector.broadcast %192 : vector<8x1xf32> to vector<8x32xf32>
    %203 = arith.subf %188, %202 : vector<8x32xf32>
    %cst_66 = arith.constant 9.99999974E-6 : f32
    %204 = vector.broadcast %cst_66 : f32 to vector<8x1xf32>
    %205 = arith.addf %201, %204 : vector<8x1xf32>
    %206 = math.rsqrt %205 : vector<8x1xf32>
    %207 = vector.broadcast %206 : vector<8x1xf32> to vector<8x32xf32>
    %208 = arith.mulf %203, %207 : vector<8x32xf32>
    %209 = vector.broadcast %9 : vector<1x32xf32> to vector<8x32xf32>
    %210 = arith.mulf %208, %209 : vector<8x32xf32>
    %211 = vector.broadcast %10 : vector<1x32xf32> to vector<8x32xf32>
    %212 = arith.addf %210, %211 : vector<8x32xf32>
    %c2_i32 = arith.constant 2 : i32
    %cst_67 = arith.constant dense<0.000000e+00> : vector<8x128xf32>
    %213 = tpu.matmul %212, %13, %cst_67 {dimension_numbers = #tpu.dot_dimension_numbers<[1], [0], [0], [1], [0, 0, 1, 1], [], []>} : vector<8x32xf32>, vector<32x128xf32>, vector<8x128xf32> -> vector<8x128xf32>
    %214 = vector.broadcast %0 : vector<1x128xf32> to vector<8x128xf32>
    %215 = arith.addf %213, %214 : vector<8x128xf32>
    %cst_68 = arith.constant 0.000000e+00 : f32
    %216 = vector.broadcast %cst_68 : f32 to vector<8x128xf32>
    %217 = arith.maximumf %215, %216 : vector<8x128xf32>
    %cst_69 = arith.constant dense<0.000000e+00> : vector<8xf32>
    %218 = vector.multi_reduction <add>, %217, %cst_69 [1] : vector<8x128xf32> to vector<8xf32>
    %219 = vector.shape_cast %218 : vector<8xf32> to vector<8x1xf32>
    %cst_70 = arith.constant 1.280000e+02 : f32
    %220 = vector.broadcast %cst_70 : f32 to vector<8x1xf32>
    %221 = arith.divf %219, %220 : vector<8x1xf32>
    %222 = vector.broadcast %221 : vector<8x1xf32> to vector<8x128xf32>
    %223 = arith.subf %217, %222 : vector<8x128xf32>
    %224 = vector.broadcast %221 : vector<8x1xf32> to vector<8x128xf32>
    %225 = arith.subf %217, %224 : vector<8x128xf32>
    %226 = arith.mulf %223, %225 : vector<8x128xf32>
    %cst_71 = arith.constant dense<0.000000e+00> : vector<8xf32>
    %227 = vector.multi_reduction <add>, %226, %cst_71 [1] : vector<8x128xf32> to vector<8xf32>
    %228 = vector.shape_cast %227 : vector<8xf32> to vector<8x1xf32>
    %cst_72 = arith.constant 1.280000e+02 : f32
    %229 = vector.broadcast %cst_72 : f32 to vector<8x1xf32>
    %230 = arith.divf %228, %229 : vector<8x1xf32>
    %231 = vector.broadcast %221 : vector<8x1xf32> to vector<8x128xf32>
    %232 = arith.subf %217, %231 : vector<8x128xf32>
    %cst_73 = arith.constant 9.99999974E-6 : f32
    %233 = vector.broadcast %cst_73 : f32 to vector<8x1xf32>
    %234 = arith.addf %230, %233 : vector<8x1xf32>
    %235 = math.rsqrt %234 : vector<8x1xf32>
    %236 = vector.broadcast %235 : vector<8x1xf32> to vector<8x128xf32>
    %237 = arith.mulf %232, %236 : vector<8x128xf32>
    %238 = vector.broadcast %1 : vector<1x128xf32> to vector<8x128xf32>
    %239 = arith.mulf %237, %238 : vector<8x128xf32>
    %240 = vector.broadcast %2 : vector<1x128xf32> to vector<8x128xf32>
    %241 = arith.addf %239, %240 : vector<8x128xf32>
    %cst_74 = arith.constant dense<0.000000e+00> : vector<8x32xf32>
    %242 = tpu.matmul %241, %14, %cst_74 {dimension_numbers = #tpu.dot_dimension_numbers<[1], [0], [0], [1], [0, 0, 1, 1], [], []>} : vector<8x128xf32>, vector<128x32xf32>, vector<8x32xf32> -> vector<8x32xf32>
    %243 = vector.broadcast %6 : vector<1x32xf32> to vector<8x32xf32>
    %244 = arith.addf %242, %243 : vector<8x32xf32>
    %245 = arith.addf %43, %244 : vector<8x32xf32>
    %cst_75 = arith.constant dense<0.000000e+00> : vector<8xf32>
    %246 = vector.multi_reduction <add>, %245, %cst_75 [1] : vector<8x32xf32> to vector<8xf32>
    %247 = vector.shape_cast %246 : vector<8xf32> to vector<8x1xf32>
    %cst_76 = arith.constant 3.200000e+01 : f32
    %248 = vector.broadcast %cst_76 : f32 to vector<8x1xf32>
    %249 = arith.divf %247, %248 : vector<8x1xf32>
    %250 = vector.broadcast %249 : vector<8x1xf32> to vector<8x32xf32>
    %251 = arith.subf %245, %250 : vector<8x32xf32>
    %252 = vector.broadcast %249 : vector<8x1xf32> to vector<8x32xf32>
    %253 = arith.subf %245, %252 : vector<8x32xf32>
    %254 = arith.mulf %251, %253 : vector<8x32xf32>
    %cst_77 = arith.constant dense<0.000000e+00> : vector<8xf32>
    %255 = vector.multi_reduction <add>, %254, %cst_77 [1] : vector<8x32xf32> to vector<8xf32>
    %256 = vector.shape_cast %255 : vector<8xf32> to vector<8x1xf32>
    %cst_78 = arith.constant 3.200000e+01 : f32
    %257 = vector.broadcast %cst_78 : f32 to vector<8x1xf32>
    %258 = arith.divf %256, %257 : vector<8x1xf32>
    %259 = vector.broadcast %249 : vector<8x1xf32> to vector<8x32xf32>
    %260 = arith.subf %245, %259 : vector<8x32xf32>
    %cst_79 = arith.constant 9.99999974E-6 : f32
    %261 = vector.broadcast %cst_79 : f32 to vector<8x1xf32>
    %262 = arith.addf %258, %261 : vector<8x1xf32>
    %263 = math.rsqrt %262 : vector<8x1xf32>
    %264 = vector.broadcast %263 : vector<8x1xf32> to vector<8x32xf32>
    %265 = arith.mulf %260, %264 : vector<8x32xf32>
    %266 = vector.broadcast %7 : vector<1x32xf32> to vector<8x32xf32>
    %267 = arith.mulf %265, %266 : vector<8x32xf32>
    %268 = vector.broadcast %8 : vector<1x32xf32> to vector<8x32xf32>
    %269 = arith.addf %267, %268 : vector<8x32xf32>
    %270 = arith.addf %212, %269 : vector<8x32xf32>
    %cst_80 = arith.constant 0.000000e+00 : f32
    %271 = vector.broadcast %cst_80 : f32 to vector<8x32xf32>
    %272 = arith.maximumf %270, %271 : vector<8x32xf32>
    %cst_81 = arith.constant dense<0.000000e+00> : vector<8xf32>
    %273 = vector.multi_reduction <add>, %272, %cst_81 [1] : vector<8x32xf32> to vector<8xf32>
    %274 = vector.shape_cast %273 : vector<8xf32> to vector<8x1xf32>
    %cst_82 = arith.constant 3.200000e+01 : f32
    %275 = vector.broadcast %cst_82 : f32 to vector<8x1xf32>
    %276 = arith.divf %274, %275 : vector<8x1xf32>
    %277 = vector.broadcast %276 : vector<8x1xf32> to vector<8x32xf32>
    %278 = arith.subf %272, %277 : vector<8x32xf32>
    %279 = vector.broadcast %276 : vector<8x1xf32> to vector<8x32xf32>
    %280 = arith.subf %272, %279 : vector<8x32xf32>
    %281 = arith.mulf %278, %280 : vector<8x32xf32>
    %cst_83 = arith.constant dense<0.000000e+00> : vector<8xf32>
    %282 = vector.multi_reduction <add>, %281, %cst_83 [1] : vector<8x32xf32> to vector<8xf32>
    %283 = vector.shape_cast %282 : vector<8xf32> to vector<8x1xf32>
    %cst_84 = arith.constant 3.200000e+01 : f32
    %284 = vector.broadcast %cst_84 : f32 to vector<8x1xf32>
    %285 = arith.divf %283, %284 : vector<8x1xf32>
    %286 = vector.broadcast %276 : vector<8x1xf32> to vector<8x32xf32>
    %287 = arith.subf %272, %286 : vector<8x32xf32>
    %cst_85 = arith.constant 9.99999974E-6 : f32
    %288 = vector.broadcast %cst_85 : f32 to vector<8x1xf32>
    %289 = arith.addf %285, %288 : vector<8x1xf32>
    %290 = math.rsqrt %289 : vector<8x1xf32>
    %291 = vector.broadcast %290 : vector<8x1xf32> to vector<8x32xf32>
    %292 = arith.mulf %287, %291 : vector<8x32xf32>
    %293 = vector.broadcast %9 : vector<1x32xf32> to vector<8x32xf32>
    %294 = arith.mulf %292, %293 : vector<8x32xf32>
    %295 = vector.broadcast %10 : vector<1x32xf32> to vector<8x32xf32>
    %296 = arith.addf %294, %295 : vector<8x32xf32>
    %c3_i32 = arith.constant 3 : i32
    %cst_86 = arith.constant dense<0.000000e+00> : vector<8x128xf32>
    %297 = tpu.matmul %296, %13, %cst_86 {dimension_numbers = #tpu.dot_dimension_numbers<[1], [0], [0], [1], [0, 0, 1, 1], [], []>} : vector<8x32xf32>, vector<32x128xf32>, vector<8x128xf32> -> vector<8x128xf32>
    %298 = vector.broadcast %0 : vector<1x128xf32> to vector<8x128xf32>
    %299 = arith.addf %297, %298 : vector<8x128xf32>
    %cst_87 = arith.constant 0.000000e+00 : f32
    %300 = vector.broadcast %cst_87 : f32 to vector<8x128xf32>
    %301 = arith.maximumf %299, %300 : vector<8x128xf32>
    %cst_88 = arith.constant dense<0.000000e+00> : vector<8xf32>
    %302 = vector.multi_reduction <add>, %301, %cst_88 [1] : vector<8x128xf32> to vector<8xf32>
    %303 = vector.shape_cast %302 : vector<8xf32> to vector<8x1xf32>
    %cst_89 = arith.constant 1.280000e+02 : f32
    %304 = vector.broadcast %cst_89 : f32 to vector<8x1xf32>
    %305 = arith.divf %303, %304 : vector<8x1xf32>
    %306 = vector.broadcast %305 : vector<8x1xf32> to vector<8x128xf32>
    %307 = arith.subf %301, %306 : vector<8x128xf32>
    %308 = vector.broadcast %305 : vector<8x1xf32> to vector<8x128xf32>
    %309 = arith.subf %301, %308 : vector<8x128xf32>
    %310 = arith.mulf %307, %309 : vector<8x128xf32>
    %cst_90 = arith.constant dense<0.000000e+00> : vector<8xf32>
    %311 = vector.multi_reduction <add>, %310, %cst_90 [1] : vector<8x128xf32> to vector<8xf32>
    %312 = vector.shape_cast %311 : vector<8xf32> to vector<8x1xf32>
    %cst_91 = arith.constant 1.280000e+02 : f32
    %313 = vector.broadcast %cst_91 : f32 to vector<8x1xf32>
    %314 = arith.divf %312, %313 : vector<8x1xf32>
    %315 = vector.broadcast %305 : vector<8x1xf32> to vector<8x128xf32>
    %316 = arith.subf %301, %315 : vector<8x128xf32>
    %cst_92 = arith.constant 9.99999974E-6 : f32
    %317 = vector.broadcast %cst_92 : f32 to vector<8x1xf32>
    %318 = arith.addf %314, %317 : vector<8x1xf32>
    %319 = math.rsqrt %318 : vector<8x1xf32>
    %320 = vector.broadcast %319 : vector<8x1xf32> to vector<8x128xf32>
    %321 = arith.mulf %316, %320 : vector<8x128xf32>
    %322 = vector.broadcast %1 : vector<1x128xf32> to vector<8x128xf32>
    %323 = arith.mulf %321, %322 : vector<8x128xf32>
    %324 = vector.broadcast %2 : vector<1x128xf32> to vector<8x128xf32>
    %325 = arith.addf %323, %324 : vector<8x128xf32>
    %cst_93 = arith.constant dense<0.000000e+00> : vector<8x32xf32>
    %326 = tpu.matmul %325, %14, %cst_93 {dimension_numbers = #tpu.dot_dimension_numbers<[1], [0], [0], [1], [0, 0, 1, 1], [], []>} : vector<8x128xf32>, vector<128x32xf32>, vector<8x32xf32> -> vector<8x32xf32>
    %327 = vector.broadcast %6 : vector<1x32xf32> to vector<8x32xf32>
    %328 = arith.addf %326, %327 : vector<8x32xf32>
    %329 = arith.addf %43, %328 : vector<8x32xf32>
    %cst_94 = arith.constant dense<0.000000e+00> : vector<8xf32>
    %330 = vector.multi_reduction <add>, %329, %cst_94 [1] : vector<8x32xf32> to vector<8xf32>
    %331 = vector.shape_cast %330 : vector<8xf32> to vector<8x1xf32>
    %cst_95 = arith.constant 3.200000e+01 : f32
    %332 = vector.broadcast %cst_95 : f32 to vector<8x1xf32>
    %333 = arith.divf %331, %332 : vector<8x1xf32>
    %334 = vector.broadcast %333 : vector<8x1xf32> to vector<8x32xf32>
    %335 = arith.subf %329, %334 : vector<8x32xf32>
    %336 = vector.broadcast %333 : vector<8x1xf32> to vector<8x32xf32>
    %337 = arith.subf %329, %336 : vector<8x32xf32>
    %338 = arith.mulf %335, %337 : vector<8x32xf32>
    %cst_96 = arith.constant dense<0.000000e+00> : vector<8xf32>
    %339 = vector.multi_reduction <add>, %338, %cst_96 [1] : vector<8x32xf32> to vector<8xf32>
    %340 = vector.shape_cast %339 : vector<8xf32> to vector<8x1xf32>
    %cst_97 = arith.constant 3.200000e+01 : f32
    %341 = vector.broadcast %cst_97 : f32 to vector<8x1xf32>
    %342 = arith.divf %340, %341 : vector<8x1xf32>
    %343 = vector.broadcast %333 : vector<8x1xf32> to vector<8x32xf32>
    %344 = arith.subf %329, %343 : vector<8x32xf32>
    %cst_98 = arith.constant 9.99999974E-6 : f32
    %345 = vector.broadcast %cst_98 : f32 to vector<8x1xf32>
    %346 = arith.addf %342, %345 : vector<8x1xf32>
    %347 = math.rsqrt %346 : vector<8x1xf32>
    %348 = vector.broadcast %347 : vector<8x1xf32> to vector<8x32xf32>
    %349 = arith.mulf %344, %348 : vector<8x32xf32>
    %350 = vector.broadcast %7 : vector<1x32xf32> to vector<8x32xf32>
    %351 = arith.mulf %349, %350 : vector<8x32xf32>
    %352 = vector.broadcast %8 : vector<1x32xf32> to vector<8x32xf32>
    %353 = arith.addf %351, %352 : vector<8x32xf32>
    %354 = arith.addf %296, %353 : vector<8x32xf32>
    %cst_99 = arith.constant 0.000000e+00 : f32
    %355 = vector.broadcast %cst_99 : f32 to vector<8x32xf32>
    %356 = arith.maximumf %354, %355 : vector<8x32xf32>
    %cst_100 = arith.constant dense<0.000000e+00> : vector<8xf32>
    %357 = vector.multi_reduction <add>, %356, %cst_100 [1] : vector<8x32xf32> to vector<8xf32>
    %358 = vector.shape_cast %357 : vector<8xf32> to vector<8x1xf32>
    %cst_101 = arith.constant 3.200000e+01 : f32
    %359 = vector.broadcast %cst_101 : f32 to vector<8x1xf32>
    %360 = arith.divf %358, %359 : vector<8x1xf32>
    %361 = vector.broadcast %360 : vector<8x1xf32> to vector<8x32xf32>
    %362 = arith.subf %356, %361 : vector<8x32xf32>
    %363 = vector.broadcast %360 : vector<8x1xf32> to vector<8x32xf32>
    %364 = arith.subf %356, %363 : vector<8x32xf32>
    %365 = arith.mulf %362, %364 : vector<8x32xf32>
    %cst_102 = arith.constant dense<0.000000e+00> : vector<8xf32>
    %366 = vector.multi_reduction <add>, %365, %cst_102 [1] : vector<8x32xf32> to vector<8xf32>
    %367 = vector.shape_cast %366 : vector<8xf32> to vector<8x1xf32>
    %cst_103 = arith.constant 3.200000e+01 : f32
    %368 = vector.broadcast %cst_103 : f32 to vector<8x1xf32>
    %369 = arith.divf %367, %368 : vector<8x1xf32>
    %370 = vector.broadcast %360 : vector<8x1xf32> to vector<8x32xf32>
    %371 = arith.subf %356, %370 : vector<8x32xf32>
    %cst_104 = arith.constant 9.99999974E-6 : f32
    %372 = vector.broadcast %cst_104 : f32 to vector<8x1xf32>
    %373 = arith.addf %369, %372 : vector<8x1xf32>
    %374 = math.rsqrt %373 : vector<8x1xf32>
    %375 = vector.broadcast %374 : vector<8x1xf32> to vector<8x32xf32>
    %376 = arith.mulf %371, %375 : vector<8x32xf32>
    %377 = vector.broadcast %9 : vector<1x32xf32> to vector<8x32xf32>
    %378 = arith.mulf %376, %377 : vector<8x32xf32>
    %379 = vector.broadcast %10 : vector<1x32xf32> to vector<8x32xf32>
    %380 = arith.addf %378, %379 : vector<8x32xf32>
    %c4_i32 = arith.constant 4 : i32
    %cst_105 = arith.constant dense<0.000000e+00> : vector<8x128xf32>
    %381 = tpu.matmul %380, %13, %cst_105 {dimension_numbers = #tpu.dot_dimension_numbers<[1], [0], [0], [1], [0, 0, 1, 1], [], []>} : vector<8x32xf32>, vector<32x128xf32>, vector<8x128xf32> -> vector<8x128xf32>
    %382 = vector.broadcast %0 : vector<1x128xf32> to vector<8x128xf32>
    %383 = arith.addf %381, %382 : vector<8x128xf32>
    %cst_106 = arith.constant 0.000000e+00 : f32
    %384 = vector.broadcast %cst_106 : f32 to vector<8x128xf32>
    %385 = arith.maximumf %383, %384 : vector<8x128xf32>
    %cst_107 = arith.constant dense<0.000000e+00> : vector<8xf32>
    %386 = vector.multi_reduction <add>, %385, %cst_107 [1] : vector<8x128xf32> to vector<8xf32>
    %387 = vector.shape_cast %386 : vector<8xf32> to vector<8x1xf32>
    %cst_108 = arith.constant 1.280000e+02 : f32
    %388 = vector.broadcast %cst_108 : f32 to vector<8x1xf32>
    %389 = arith.divf %387, %388 : vector<8x1xf32>
    %390 = vector.broadcast %389 : vector<8x1xf32> to vector<8x128xf32>
    %391 = arith.subf %385, %390 : vector<8x128xf32>
    %392 = vector.broadcast %389 : vector<8x1xf32> to vector<8x128xf32>
    %393 = arith.subf %385, %392 : vector<8x128xf32>
    %394 = arith.mulf %391, %393 : vector<8x128xf32>
    %cst_109 = arith.constant dense<0.000000e+00> : vector<8xf32>
    %395 = vector.multi_reduction <add>, %394, %cst_109 [1] : vector<8x128xf32> to vector<8xf32>
    %396 = vector.shape_cast %395 : vector<8xf32> to vector<8x1xf32>
    %cst_110 = arith.constant 1.280000e+02 : f32
    %397 = vector.broadcast %cst_110 : f32 to vector<8x1xf32>
    %398 = arith.divf %396, %397 : vector<8x1xf32>
    %399 = vector.broadcast %389 : vector<8x1xf32> to vector<8x128xf32>
    %400 = arith.subf %385, %399 : vector<8x128xf32>
    %cst_111 = arith.constant 9.99999974E-6 : f32
    %401 = vector.broadcast %cst_111 : f32 to vector<8x1xf32>
    %402 = arith.addf %398, %401 : vector<8x1xf32>
    %403 = math.rsqrt %402 : vector<8x1xf32>
    %404 = vector.broadcast %403 : vector<8x1xf32> to vector<8x128xf32>
    %405 = arith.mulf %400, %404 : vector<8x128xf32>
    %406 = vector.broadcast %1 : vector<1x128xf32> to vector<8x128xf32>
    %407 = arith.mulf %405, %406 : vector<8x128xf32>
    %408 = vector.broadcast %2 : vector<1x128xf32> to vector<8x128xf32>
    %409 = arith.addf %407, %408 : vector<8x128xf32>
    %cst_112 = arith.constant dense<0.000000e+00> : vector<8x32xf32>
    %410 = tpu.matmul %409, %14, %cst_112 {dimension_numbers = #tpu.dot_dimension_numbers<[1], [0], [0], [1], [0, 0, 1, 1], [], []>} : vector<8x128xf32>, vector<128x32xf32>, vector<8x32xf32> -> vector<8x32xf32>
    %411 = vector.broadcast %6 : vector<1x32xf32> to vector<8x32xf32>
    %412 = arith.addf %410, %411 : vector<8x32xf32>
    %413 = arith.addf %43, %412 : vector<8x32xf32>
    %cst_113 = arith.constant dense<0.000000e+00> : vector<8xf32>
    %414 = vector.multi_reduction <add>, %413, %cst_113 [1] : vector<8x32xf32> to vector<8xf32>
    %415 = vector.shape_cast %414 : vector<8xf32> to vector<8x1xf32>
    %cst_114 = arith.constant 3.200000e+01 : f32
    %416 = vector.broadcast %cst_114 : f32 to vector<8x1xf32>
    %417 = arith.divf %415, %416 : vector<8x1xf32>
    %418 = vector.broadcast %417 : vector<8x1xf32> to vector<8x32xf32>
    %419 = arith.subf %413, %418 : vector<8x32xf32>
    %420 = vector.broadcast %417 : vector<8x1xf32> to vector<8x32xf32>
    %421 = arith.subf %413, %420 : vector<8x32xf32>
    %422 = arith.mulf %419, %421 : vector<8x32xf32>
    %cst_115 = arith.constant dense<0.000000e+00> : vector<8xf32>
    %423 = vector.multi_reduction <add>, %422, %cst_115 [1] : vector<8x32xf32> to vector<8xf32>
    %424 = vector.shape_cast %423 : vector<8xf32> to vector<8x1xf32>
    %cst_116 = arith.constant 3.200000e+01 : f32
    %425 = vector.broadcast %cst_116 : f32 to vector<8x1xf32>
    %426 = arith.divf %424, %425 : vector<8x1xf32>
    %427 = vector.broadcast %417 : vector<8x1xf32> to vector<8x32xf32>
    %428 = arith.subf %413, %427 : vector<8x32xf32>
    %cst_117 = arith.constant 9.99999974E-6 : f32
    %429 = vector.broadcast %cst_117 : f32 to vector<8x1xf32>
    %430 = arith.addf %426, %429 : vector<8x1xf32>
    %431 = math.rsqrt %430 : vector<8x1xf32>
    %432 = vector.broadcast %431 : vector<8x1xf32> to vector<8x32xf32>
    %433 = arith.mulf %428, %432 : vector<8x32xf32>
    %434 = vector.broadcast %7 : vector<1x32xf32> to vector<8x32xf32>
    %435 = arith.mulf %433, %434 : vector<8x32xf32>
    %436 = vector.broadcast %8 : vector<1x32xf32> to vector<8x32xf32>
    %437 = arith.addf %435, %436 : vector<8x32xf32>
    %438 = arith.addf %380, %437 : vector<8x32xf32>
    %cst_118 = arith.constant 0.000000e+00 : f32
    %439 = vector.broadcast %cst_118 : f32 to vector<8x32xf32>
    %440 = arith.maximumf %438, %439 : vector<8x32xf32>
    %cst_119 = arith.constant dense<0.000000e+00> : vector<8xf32>
    %441 = vector.multi_reduction <add>, %440, %cst_119 [1] : vector<8x32xf32> to vector<8xf32>
    %442 = vector.shape_cast %441 : vector<8xf32> to vector<8x1xf32>
    %cst_120 = arith.constant 3.200000e+01 : f32
    %443 = vector.broadcast %cst_120 : f32 to vector<8x1xf32>
    %444 = arith.divf %442, %443 : vector<8x1xf32>
    %445 = vector.broadcast %444 : vector<8x1xf32> to vector<8x32xf32>
    %446 = arith.subf %440, %445 : vector<8x32xf32>
    %447 = vector.broadcast %444 : vector<8x1xf32> to vector<8x32xf32>
    %448 = arith.subf %440, %447 : vector<8x32xf32>
    %449 = arith.mulf %446, %448 : vector<8x32xf32>
    %cst_121 = arith.constant dense<0.000000e+00> : vector<8xf32>
    %450 = vector.multi_reduction <add>, %449, %cst_121 [1] : vector<8x32xf32> to vector<8xf32>
    %451 = vector.shape_cast %450 : vector<8xf32> to vector<8x1xf32>
    %cst_122 = arith.constant 3.200000e+01 : f32
    %452 = vector.broadcast %cst_122 : f32 to vector<8x1xf32>
    %453 = arith.divf %451, %452 : vector<8x1xf32>
    %454 = vector.broadcast %444 : vector<8x1xf32> to vector<8x32xf32>
    %455 = arith.subf %440, %454 : vector<8x32xf32>
    %cst_123 = arith.constant 9.99999974E-6 : f32
    %456 = vector.broadcast %cst_123 : f32 to vector<8x1xf32>
    %457 = arith.addf %453, %456 : vector<8x1xf32>
    %458 = math.rsqrt %457 : vector<8x1xf32>
    %459 = vector.broadcast %458 : vector<8x1xf32> to vector<8x32xf32>
    %460 = arith.mulf %455, %459 : vector<8x32xf32>
    %461 = vector.broadcast %9 : vector<1x32xf32> to vector<8x32xf32>
    %462 = arith.mulf %460, %461 : vector<8x32xf32>
    %463 = vector.broadcast %10 : vector<1x32xf32> to vector<8x32xf32>
    %464 = arith.addf %462, %463 : vector<8x32xf32>
    %c5_i32 = arith.constant 5 : i32
    %cst_124 = arith.constant dense<0.000000e+00> : vector<8x128xf32>
    %465 = tpu.matmul %464, %13, %cst_124 {dimension_numbers = #tpu.dot_dimension_numbers<[1], [0], [0], [1], [0, 0, 1, 1], [], []>} : vector<8x32xf32>, vector<32x128xf32>, vector<8x128xf32> -> vector<8x128xf32>
    %466 = vector.broadcast %0 : vector<1x128xf32> to vector<8x128xf32>
    %467 = arith.addf %465, %466 : vector<8x128xf32>
    %cst_125 = arith.constant 0.000000e+00 : f32
    %468 = vector.broadcast %cst_125 : f32 to vector<8x128xf32>
    %469 = arith.maximumf %467, %468 : vector<8x128xf32>
    %cst_126 = arith.constant dense<0.000000e+00> : vector<8xf32>
    %470 = vector.multi_reduction <add>, %469, %cst_126 [1] : vector<8x128xf32> to vector<8xf32>
    %471 = vector.shape_cast %470 : vector<8xf32> to vector<8x1xf32>
    %cst_127 = arith.constant 1.280000e+02 : f32
    %472 = vector.broadcast %cst_127 : f32 to vector<8x1xf32>
    %473 = arith.divf %471, %472 : vector<8x1xf32>
    %474 = vector.broadcast %473 : vector<8x1xf32> to vector<8x128xf32>
    %475 = arith.subf %469, %474 : vector<8x128xf32>
    %476 = vector.broadcast %473 : vector<8x1xf32> to vector<8x128xf32>
    %477 = arith.subf %469, %476 : vector<8x128xf32>
    %478 = arith.mulf %475, %477 : vector<8x128xf32>
    %cst_128 = arith.constant dense<0.000000e+00> : vector<8xf32>
    %479 = vector.multi_reduction <add>, %478, %cst_128 [1] : vector<8x128xf32> to vector<8xf32>
    %480 = vector.shape_cast %479 : vector<8xf32> to vector<8x1xf32>
    %cst_129 = arith.constant 1.280000e+02 : f32
    %481 = vector.broadcast %cst_129 : f32 to vector<8x1xf32>
    %482 = arith.divf %480, %481 : vector<8x1xf32>
    %483 = vector.broadcast %473 : vector<8x1xf32> to vector<8x128xf32>
    %484 = arith.subf %469, %483 : vector<8x128xf32>
    %cst_130 = arith.constant 9.99999974E-6 : f32
    %485 = vector.broadcast %cst_130 : f32 to vector<8x1xf32>
    %486 = arith.addf %482, %485 : vector<8x1xf32>
    %487 = math.rsqrt %486 : vector<8x1xf32>
    %488 = vector.broadcast %487 : vector<8x1xf32> to vector<8x128xf32>
    %489 = arith.mulf %484, %488 : vector<8x128xf32>
    %490 = vector.broadcast %1 : vector<1x128xf32> to vector<8x128xf32>
    %491 = arith.mulf %489, %490 : vector<8x128xf32>
    %492 = vector.broadcast %2 : vector<1x128xf32> to vector<8x128xf32>
    %493 = arith.addf %491, %492 : vector<8x128xf32>
    %cst_131 = arith.constant dense<0.000000e+00> : vector<8x32xf32>
    %494 = tpu.matmul %493, %14, %cst_131 {dimension_numbers = #tpu.dot_dimension_numbers<[1], [0], [0], [1], [0, 0, 1, 1], [], []>} : vector<8x128xf32>, vector<128x32xf32>, vector<8x32xf32> -> vector<8x32xf32>
    %495 = vector.broadcast %6 : vector<1x32xf32> to vector<8x32xf32>
    %496 = arith.addf %494, %495 : vector<8x32xf32>
    %497 = arith.addf %43, %496 : vector<8x32xf32>
    %cst_132 = arith.constant dense<0.000000e+00> : vector<8xf32>
    %498 = vector.multi_reduction <add>, %497, %cst_132 [1] : vector<8x32xf32> to vector<8xf32>
    %499 = vector.shape_cast %498 : vector<8xf32> to vector<8x1xf32>
    %cst_133 = arith.constant 3.200000e+01 : f32
    %500 = vector.broadcast %cst_133 : f32 to vector<8x1xf32>
    %501 = arith.divf %499, %500 : vector<8x1xf32>
    %502 = vector.broadcast %501 : vector<8x1xf32> to vector<8x32xf32>
    %503 = arith.subf %497, %502 : vector<8x32xf32>
    %504 = vector.broadcast %501 : vector<8x1xf32> to vector<8x32xf32>
    %505 = arith.subf %497, %504 : vector<8x32xf32>
    %506 = arith.mulf %503, %505 : vector<8x32xf32>
    %cst_134 = arith.constant dense<0.000000e+00> : vector<8xf32>
    %507 = vector.multi_reduction <add>, %506, %cst_134 [1] : vector<8x32xf32> to vector<8xf32>
    %508 = vector.shape_cast %507 : vector<8xf32> to vector<8x1xf32>
    %cst_135 = arith.constant 3.200000e+01 : f32
    %509 = vector.broadcast %cst_135 : f32 to vector<8x1xf32>
    %510 = arith.divf %508, %509 : vector<8x1xf32>
    %511 = vector.broadcast %501 : vector<8x1xf32> to vector<8x32xf32>
    %512 = arith.subf %497, %511 : vector<8x32xf32>
    %cst_136 = arith.constant 9.99999974E-6 : f32
    %513 = vector.broadcast %cst_136 : f32 to vector<8x1xf32>
    %514 = arith.addf %510, %513 : vector<8x1xf32>
    %515 = math.rsqrt %514 : vector<8x1xf32>
    %516 = vector.broadcast %515 : vector<8x1xf32> to vector<8x32xf32>
    %517 = arith.mulf %512, %516 : vector<8x32xf32>
    %518 = vector.broadcast %7 : vector<1x32xf32> to vector<8x32xf32>
    %519 = arith.mulf %517, %518 : vector<8x32xf32>
    %520 = vector.broadcast %8 : vector<1x32xf32> to vector<8x32xf32>
    %521 = arith.addf %519, %520 : vector<8x32xf32>
    %522 = arith.addf %464, %521 : vector<8x32xf32>
    %cst_137 = arith.constant 0.000000e+00 : f32
    %523 = vector.broadcast %cst_137 : f32 to vector<8x32xf32>
    %524 = arith.maximumf %522, %523 : vector<8x32xf32>
    %cst_138 = arith.constant dense<0.000000e+00> : vector<8xf32>
    %525 = vector.multi_reduction <add>, %524, %cst_138 [1] : vector<8x32xf32> to vector<8xf32>
    %526 = vector.shape_cast %525 : vector<8xf32> to vector<8x1xf32>
    %cst_139 = arith.constant 3.200000e+01 : f32
    %527 = vector.broadcast %cst_139 : f32 to vector<8x1xf32>
    %528 = arith.divf %526, %527 : vector<8x1xf32>
    %529 = vector.broadcast %528 : vector<8x1xf32> to vector<8x32xf32>
    %530 = arith.subf %524, %529 : vector<8x32xf32>
    %531 = vector.broadcast %528 : vector<8x1xf32> to vector<8x32xf32>
    %532 = arith.subf %524, %531 : vector<8x32xf32>
    %533 = arith.mulf %530, %532 : vector<8x32xf32>
    %cst_140 = arith.constant dense<0.000000e+00> : vector<8xf32>
    %534 = vector.multi_reduction <add>, %533, %cst_140 [1] : vector<8x32xf32> to vector<8xf32>
    %535 = vector.shape_cast %534 : vector<8xf32> to vector<8x1xf32>
    %cst_141 = arith.constant 3.200000e+01 : f32
    %536 = vector.broadcast %cst_141 : f32 to vector<8x1xf32>
    %537 = arith.divf %535, %536 : vector<8x1xf32>
    %538 = vector.broadcast %528 : vector<8x1xf32> to vector<8x32xf32>
    %539 = arith.subf %524, %538 : vector<8x32xf32>
    %cst_142 = arith.constant 9.99999974E-6 : f32
    %540 = vector.broadcast %cst_142 : f32 to vector<8x1xf32>
    %541 = arith.addf %537, %540 : vector<8x1xf32>
    %542 = math.rsqrt %541 : vector<8x1xf32>
    %543 = vector.broadcast %542 : vector<8x1xf32> to vector<8x32xf32>
    %544 = arith.mulf %539, %543 : vector<8x32xf32>
    %545 = vector.broadcast %9 : vector<1x32xf32> to vector<8x32xf32>
    %546 = arith.mulf %544, %545 : vector<8x32xf32>
    %547 = vector.broadcast %10 : vector<1x32xf32> to vector<8x32xf32>
    %548 = arith.addf %546, %547 : vector<8x32xf32>
    %cst_143 = arith.constant dense<0.000000e+00> : vector<8x16xf32>
    %549 = tpu.matmul %548, %15, %cst_143 {dimension_numbers = #tpu.dot_dimension_numbers<[1], [0], [0], [1], [0, 0, 1, 1], [], []>} : vector<8x32xf32>, vector<32x16xf32>, vector<8x16xf32> -> vector<8x16xf32>
    %550 = vector.broadcast %11 : vector<1x16xf32> to vector<8x16xf32>
    %551 = arith.addf %549, %550 : vector<8x16xf32>
    %c0_144 = arith.constant 0 : index
    %c0_145 = arith.constant 0 : index
    %552 = vector.load %arg8[%c0_144, %c0_145] : memref<8x128xf32, #tpu.memory_space<vmem>>, vector<8x32xf32>
    tpu.vector_store %arg8[%c0_144, %c0_145], %548 {strides = array<i32>} : memref<8x128xf32, #tpu.memory_space<vmem>>, vector<8x32xf32>,
    %c0_146 = arith.constant 0 : index
    %c32 = arith.constant 32 : index
    %553 = vector.load %arg8[%c0_146, %c32] : memref<8x128xf32, #tpu.memory_space<vmem>>, vector<8x32xf32>
    tpu.vector_store %arg8[%c0_146, %c32], %464 {strides = array<i32>} : memref<8x128xf32, #tpu.memory_space<vmem>>, vector<8x32xf32>,
    %c0_147 = arith.constant 0 : index
    %c64 = arith.constant 64 : index
    %554 = vector.load %arg8[%c0_147, %c64] : memref<8x128xf32, #tpu.memory_space<vmem>>, vector<8x16xf32>
    tpu.vector_store %arg8[%c0_147, %c64], %551 {strides = array<i32>} : memref<8x128xf32, #tpu.memory_space<vmem>>, vector<8x16xf32>,
    %cst_148 = arith.constant 0.000000e+00 : f32
    %555 = vector.broadcast %cst_148 : f32 to vector<8x48xf32>
    %c0_149 = arith.constant 0 : index
    %c80 = arith.constant 80 : index
    %556 = vector.load %arg8[%c0_149, %c80] : memref<8x128xf32, #tpu.memory_space<vmem>>, vector<8x48xf32>
    tpu.vector_store %arg8[%c0_149, %c80], %555 {strides = array<i32>} : memref<8x128xf32, #tpu.memory_space<vmem>>, vector<8x48xf32>,
    return
  }
  func.func @transform_0(%arg0: i32) -> (i32, i32) {
    %c0_i32 = arith.constant 0 : i32
    %c0_i32_0 = arith.constant 0 : i32
    return %arg0, %c0_i32 : i32, i32
  }
  func.func @transform_1(%arg0: i32) -> (i32, i32) {
    %c0_i32 = arith.constant 0 : i32
    %c0_i32_0 = arith.constant 0 : i32
    return %arg0, %c0_i32 : i32, i32
  }
  func.func @transform_2(%arg0: i32) -> (i32, i32) {
    %c0_i32 = arith.constant 0 : i32
    %c0_i32_0 = arith.constant 0 : i32
    %c0_i32_1 = arith.constant 0 : i32
    return %c0_i32, %c0_i32_0 : i32, i32
  }
  func.func @transform_3(%arg0: i32) -> (i32, i32) {
    %c0_i32 = arith.constant 0 : i32
    %c0_i32_0 = arith.constant 0 : i32
    %c0_i32_1 = arith.constant 0 : i32
    return %c0_i32, %c0_i32_0 : i32, i32
  }
  func.func @transform_4(%arg0: i32) -> (i32, i32) {
    %c0_i32 = arith.constant 0 : i32
    %c0_i32_0 = arith.constant 0 : i32
    %c0_i32_1 = arith.constant 0 : i32
    return %c0_i32, %c0_i32_0 : i32, i32
  }
  func.func @transform_5(%arg0: i32) -> (i32, i32) {
    %c0_i32 = arith.constant 0 : i32
    %c0_i32_0 = arith.constant 0 : i32
    %c0_i32_1 = arith.constant 0 : i32
    return %c0_i32, %c0_i32_0 : i32, i32
  }
  func.func @transform_6(%arg0: i32) -> (i32, i32) {
    %c0_i32 = arith.constant 0 : i32
    %c0_i32_0 = arith.constant 0 : i32
    %c0_i32_1 = arith.constant 0 : i32
    return %c0_i32, %c0_i32_0 : i32, i32
  }
  func.func @transform_7(%arg0: i32) -> (i32, i32) {
    %c0_i32 = arith.constant 0 : i32
    %c0_i32_0 = arith.constant 0 : i32
    return %arg0, %c0_i32 : i32, i32
  }
}

</mosaic_0001>

<bundles_post_ra>
// kernel: deq_layer_forward.1
= control target key start
LH: loop header
LB: loop body
LE: loop exit
PB: predicated region body
PF: predicated region fallthrough
CT: control target
= control target key end

     0   :  { %vm71_vm0 = vcmask 1043456   ;;  %vm67_vm1 = vcmask 162816   ;;  %vm95_vm2 = vcmask 261120   ;;  %v958_v17 = vmov 128.0   ;;  %s961_s29 = smov 64   ;;  %s1469_s2 = inlined_call_operand.vmem [shape: f32[20,32], index: 2, kind: input, shape index: {}]   ;;  %s1470_s3 = inlined_call_operand.vmem [shape: f32[32,128], index: 3, kind: input, shape index: {}]   ;;  %s1471_s0 = inlined_call_operand.vmem [shape: f32[8,20], index: 0, kind: input, shape index: {}]   ;;  %s1472_s1 = inlined_call_operand.vmem [shape: f32[8,32], index: 1, kind: input, shape index: {}]   ;;  %s1473_s6 = inlined_call_operand.vmem [shape: f32[16,128], index: 6, kind: input, shape index: {}]   ;;  %s1474_s4 = inlined_call_operand.vmem [shape: f32[128,32], index: 4, kind: input, shape index: {}]   ;;  %s1475_s5 = inlined_call_operand.vmem [shape: f32[32,16], index: 5, kind: input, shape index: {}]   ;;  %s1476_s7 = inlined_call_operand.vmem [shape: f32[8,128], index: 7, kind: output, shape index: {}]  }
   0x1   :  { %v40_v0 = vld [vmem:[%s1469_s2 + $0x10] sm:$0xf]  ;;  %v1009_v1 = vld [vmem:[%s1470_s3 + $0x18] sm:$0xff]  ;;  %v39_v2 = vld [vmem:[%s1469_s2 + $0x8] sm:$0xff]  ;;  %915 = vrcp.f32 %v958_v17  ;;  %v959_v18 = vmov 32.0  }
   0x2   :  { %889 = vmatpush.msk.msra.mxu2 %vm71_vm0, %v40_v0  ;;  %146 = vmatpush.msra.mxu1 %v1009_v1  ;;  %v1018_v3 = vld [vmem:[%s1470_s3 + $0x10] sm:$0xff]  ;;  %v38_v4 = vld [vmem:[%s1469_s2] sm:$0xff]  ;;  %v1026_v5 = vld [vmem:[%s1470_s3 + $0x8] sm:$0xff]  ;;  %917 = vrcp.f32 %v959_v18 }
   0x3   :  { %v65_v6 = vld [vmem:[%s1471_s0] sm:$0xff]  ;;  %v1067_v20 = vld [vmem:[%s1474_s4 + $0x78] sm:$0xff]  ;;  %v1072_v21 = vld [vmem:[%s1474_s4 + $0x70] sm:$0xff] }
   0x4   :  { %v1034_v7 = vld [vmem:[%s1470_s3] sm:$0xff]  ;;  %89 = vmatpush.msra.mxu2 %v39_v2  ;;  %147 = vmatpush.msra.mxu1 %v1018_v3  ;;  %v1098_v42 = vld [vmem:[%s1474_s4 + $0x68] sm:$0xff]  ;;  %v1113_v44 = vld [vmem:[%s1474_s4 + $0x58] sm:$0xff] }
   0x5   :  { %v1040_v8 = vld [vmem:[%s1472_s1] sm:$0xff]  ;;  %308 = vmatpush.msra.mxu0 %v1067_v20  ;;  %425 = vmatpush.msra.mxu3 %v1067_v20  ;;  %v1121_v45 = vld [vmem:[%s1474_s4 + $0x50] sm:$0xff]  ;;  %v1129_v46 = vld [vmem:[%s1474_s4 + $0x48] sm:$0xff]  ;;  %s960_s1 = smov 32  }
   0x6   :  { %90 = vmatpush.msra.mxu2 %v38_v4  ;;  %148 = vmatpush.msra.mxu1 %v1026_v5  ;;  %v1057_v9 = vld [vmem:[%s1473_s6] ss:$0 sm:$0xff]  ;;  %v904_v12 = vld [vmem:[%s1473_s6 + $0x3] ss:$0 sm:$0xff]  ;;  %v1145_v48 = vld [vmem:[%s1474_s4 + $0x38] sm:$0xff] }
   0x7   :  { %890 = vmatmul.msk.f32.vlgmr.msra.gmra.mxu2 %vm67_vm1, %v65_v6  ;;  %v916_v19 = vpop.eup %915  ;;  %309 = vmatpush.msra.mxu0 %v1072_v21  ;;  %v1105_v43 = vld [vmem:[%s1474_s4 + $0x60] sm:$0xff]  ;;  %v1153_v49 = vld [vmem:[%s1474_s4 + $0x30] sm:$0xff]  ;;  %v1161_v50 = vld [vmem:[%s1474_s4 + $0x28] sm:$0xff] }
   0x8   :  { %149 = vmatpush.msra.mxu1 %v1034_v7  ;;  %187 = vmatpush.msrb.mxu2 %v1067_v20  ;;  %v918_v22 = vpop.eup %917  ;;  %v158_v23 = vmul.f32 128.0, %v916_v19  ;;  %vm162_vm3 = vweird.f32 %v916_v19  ;;  %v1137_v47 = vld [vmem:[%s1474_s4 + $0x40] sm:$0xff]  ;;  %v1177_v52 = vld [vmem:[%s1474_s4 + $0x18] sm:$0xff]  ;;  %v1185_v53 = vld [vmem:[%s1474_s4 + $0x10] sm:$0xff] }
   0x9   :  { %891 = vmatmul.msk.f32.vlgmr.msra.gmra.mxu1 %vm95_vm2, %v1040_v8  ;;  %426 = vmatpush.msra.mxu3 %v1072_v21  ;;  %v100_v24 = vmul.f32 32.0, %v918_v22  ;;  %vm104_vm4 = vweird.f32 %v918_v22  ;;  %v1169_v51 = vld [vmem:[%s1474_s4 + $0x20] sm:$0xff]  ;;  %v1193_v54 = vld [vmem:[%s1474_s4 + $0x8] sm:$0xff] }
   0xa   :  { %277 = vmatpush.msrb.mxu1 %v1009_v1  ;;  %188 = vmatpush.msrb.mxu2 %v1072_v21  ;;  %v159_v25 = vsub.f32 1.0, %v158_v23  ;;  %v1201_v55 = vld [vmem:[%s1474_s4] sm:$0xff] }
   0xb   :  { %v101_v26 = vsub.f32 1.0, %v100_v24  ;;  %310 = vmatpush.msra.mxu0 %v1098_v42  ;;  %427 = vmatpush.msra.mxu3 %v1098_v42  ;;  %v1239_v2 = vld [vmem:[%s1473_s6 + $0x1] ss:$0 sm:$0xff] }
   0xc   :  { %278 = vmatpush.msrb.mxu1 %v1018_v3  ;;  %v160_v27 = vmul.f32 %v916_v19, %v159_v25  ;;  %189 = vmatpush.msrb.mxu2 %v1098_v42  ;;  %v905_v25 = vld [vmem:[%s1473_s6 + $0x4] ss:$0 sm:$0xff] }
   0xd   :  { %v102_v28 = vmul.f32 %v918_v22, %v101_v26  ;;  %311 = vmatpush.msra.mxu0 %v1105_v43  ;;  %428 = vmatpush.msra.mxu3 %v1105_v43 }
   0xe   :  { %279 = vmatpush.msrb.mxu1 %v1026_v5  ;;  %v161_v29 = vadd.f32 %v916_v19, %v160_v27  ;;  %190 = vmatpush.msrb.mxu2 %v1105_v43  ;;  %v906_v27 = vld [vmem:[%s1473_s6 + $0x5] ss:$0 sm:$0xff] }
   0xf   :  { %v103_v30 = vadd.f32 %v918_v22, %v102_v28  ;;  %312 = vmatpush.msra.mxu0 %v1113_v44  ;;  %429 = vmatpush.msra.mxu3 %v1113_v44 }
  0x10   :  { %280 = vmatpush.msrb.mxu1 %v1034_v7  ;;  %v1080_v31 = vsel %vm162_vm3, %v916_v19, %v161_v29  ;;  %191 = vmatpush.msrb.mxu2 %v1113_v44  ;;  %v1272_v29 = vld [vmem:[%s1473_s6 + $0x6] ss:$0 sm:$0xff] }
  0x11   :  { %v1083_v34 = vsel %vm104_vm4, %v918_v22, %v103_v30  ;;  %313 = vmatpush.msra.mxu0 %v1121_v45  ;;  %430 = vmatpush.msra.mxu3 %v1121_v45 }
  0x12   :  { %394 = vmatpush.msra.mxu1 %v1009_v1  ;;  %192 = vmatpush.msrb.mxu2 %v1121_v45 }
  0x13   :  { %314 = vmatpush.msra.mxu0 %v1129_v46  ;;  %431 = vmatpush.msra.mxu3 %v1129_v46 }
  0x14   :  { %395 = vmatpush.msra.mxu1 %v1018_v3  ;;  %193 = vmatpush.msrb.mxu2 %v1129_v46 }
  0x15   :  { %315 = vmatpush.msra.mxu0 %v1137_v47  ;;  %432 = vmatpush.msra.mxu3 %v1137_v47 }
  0x16   :  { %396 = vmatpush.msra.mxu1 %v1026_v5  ;;  %194 = vmatpush.msrb.mxu2 %v1137_v47 }
  0x17   :  { %316 = vmatpush.msra.mxu0 %v1145_v48  ;;  %433 = vmatpush.msra.mxu3 %v1145_v48 }
  0x18   :  { %397 = vmatpush.msra.mxu1 %v1034_v7  ;;  %195 = vmatpush.msrb.mxu2 %v1145_v48 }
  0x19   :  { %317 = vmatpush.msra.mxu0 %v1153_v49  ;;  %434 = vmatpush.msra.mxu3 %v1153_v49 }
  0x1a   :  { %196 = vmatpush.msrb.mxu2 %v1153_v49 }
  0x1b   :  { %318 = vmatpush.msra.mxu0 %v1161_v50  ;;  %435 = vmatpush.msra.mxu3 %v1161_v50 }
  0x1c   :  { %197 = vmatpush.msrb.mxu2 %v1161_v50 }
  0x1d   :  { %319 = vmatpush.msra.mxu0 %v1169_v51  ;;  %436 = vmatpush.msra.mxu3 %v1169_v51 }
  0x1e   :  { %198 = vmatpush.msrb.mxu2 %v1169_v51 }
  0x1f   :  { %320 = vmatpush.msra.mxu0 %v1177_v52  ;;  %437 = vmatpush.msra.mxu3 %v1177_v52 }
  0x20   :  { %199 = vmatpush.msrb.mxu2 %v1177_v52 }
  0x21   :  { %321 = vmatpush.msra.mxu0 %v1185_v53  ;;  %438 = vmatpush.msra.mxu3 %v1185_v53 }
  0x22   :  { %200 = vmatpush.msrb.mxu2 %v1185_v53 }
  0x23   :  { %322 = vmatpush.msra.mxu0 %v1193_v54  ;;  %439 = vmatpush.msra.mxu3 %v1193_v54 }
  0x24   :  { %201 = vmatpush.msrb.mxu2 %v1193_v54 }
  0x25   :  { %323 = vmatpush.msra.mxu0 %v1201_v55  ;;  %440 = vmatpush.msra.mxu3 %v1201_v55 }
  0x26   :  { %202 = vmatpush.msrb.mxu2 %v1201_v55 }
  0x27   :  { %659 = vmatpush.msrb.mxu0 %v1067_v20  ;;  %776 = vmatpush.msrb.mxu3 %v1067_v20 }
  0x28   :  { %628 = vmatpush.msra.mxu2 %v1009_v1 }
  0x29   :  { %660 = vmatpush.msrb.mxu0 %v1072_v21  ;;  %777 = vmatpush.msrb.mxu3 %v1072_v21 }
  0x2a   :  { %629 = vmatpush.msra.mxu2 %v1018_v3 }
  0x2b   :  { %661 = vmatpush.msrb.mxu0 %v1098_v42  ;;  %778 = vmatpush.msrb.mxu3 %v1098_v42 }
  0x2c   :  { %630 = vmatpush.msra.mxu2 %v1026_v5 }
  0x2d   :  { %662 = vmatpush.msrb.mxu0 %v1105_v43  ;;  %779 = vmatpush.msrb.mxu3 %v1105_v43 }
  0x2e   :  { %631 = vmatpush.msra.mxu2 %v1034_v7 }
  0x2f   :  { %663 = vmatpush.msrb.mxu0 %v1113_v44  ;;  %780 = vmatpush.msrb.mxu3 %v1113_v44 }
  0x31   :  { %664 = vmatpush.msrb.mxu0 %v1121_v45  ;;  %781 = vmatpush.msrb.mxu3 %v1121_v45 }
  0x33   :  { %665 = vmatpush.msrb.mxu0 %v1129_v46  ;;  %782 = vmatpush.msrb.mxu3 %v1129_v46 }
  0x35   :  { %666 = vmatpush.msrb.mxu0 %v1137_v47  ;;  %783 = vmatpush.msrb.mxu3 %v1137_v47 }
  0x37   :  { %667 = vmatpush.msrb.mxu0 %v1145_v48  ;;  %784 = vmatpush.msrb.mxu3 %v1145_v48 }
  0x39   :  { %668 = vmatpush.msrb.mxu0 %v1153_v49  ;;  %785 = vmatpush.msrb.mxu3 %v1153_v49 }
  0x3b   :  { %669 = vmatpush.msrb.mxu0 %v1161_v50  ;;  %786 = vmatpush.msrb.mxu3 %v1161_v50 }
  0x3d   :  { %670 = vmatpush.msrb.mxu0 %v1169_v51  ;;  %787 = vmatpush.msrb.mxu3 %v1169_v51 }
  0x3f   :  { %671 = vmatpush.msrb.mxu0 %v1177_v52  ;;  %788 = vmatpush.msrb.mxu3 %v1177_v52 }
  0x41   :  { %672 = vmatpush.msrb.mxu0 %v1185_v53  ;;  %789 = vmatpush.msrb.mxu3 %v1185_v53 }
  0x43   :  { %673 = vmatpush.msrb.mxu0 %v1193_v54  ;;  %790 = vmatpush.msrb.mxu3 %v1193_v54 }
  0x45   :  { %674 = vmatpush.msrb.mxu0 %v1201_v55  ;;  %791 = vmatpush.msrb.mxu3 %v1201_v55 }
  0x86   :  { %v151_v10 = vpop.f32.mrf.mxu1 }
  0x87   :  { %v152_v11 = vadd.f32 %v1057_v9, %v151_v10  ;;  %v1247_v10 = vld [vmem:[%s1473_s6 + $0x2] ss:$0 sm:$0xff] }
  0x89   :  { %v154_v13 = vmax.f32 %v152_v11, 0.0 }
  0x8a   :  { %v92_v14 = vpop.f32.mrf.mxu2 }
  0x8b   :  { %v93_v15 = vadd.f32 %v904_v12, %v92_v14  ;;  %155 = vadd.xlane.f32.xlu0 %v154_v13 }
  0x8d   :  { %v96_v16 = vsel %vm95_vm2, %v93_v15, 0.0 }
  0x8e   :  { %97 = vadd.xlane.f32.xlu1 %v96_v16 }
  0xfe   :  { %v156_v32 = vpop.xlane.xlu0 %155 }
  0xff   :  { %v164_v33 = vmul.f32 %v1080_v31, %v156_v32 }
 0x101   :  { %v1085_v35 = vsub.f32 %v154_v13, %v164_v33  ;;  %v98_v36 = vpop.xlane.xlu1 %97 }
 0x102   :  { %v106_v37 = vmul.f32 %v1083_v34, %v98_v36 }
 0x103   :  { %v166_v38 = vmul.f32 %v1085_v35, %v1085_v35 }
 0x104   :  { %v1090_v39 = vsub.f32 %v93_v15, %v106_v37 }
 0x105   :  { %167 = vadd.xlane.f32.xlu0 %v166_v38 }
 0x106   :  { %v108_v40 = vmul.f32 %v1090_v39, %v1090_v39 }
 0x108   :  { %v109_v41 = vsel %vm95_vm2, %v108_v40, 0.0 }
 0x109   :  { %110 = vadd.xlane.f32.xlu1 %v109_v41 }
 0x178   :  { %v168_v56 = vpop.xlane.xlu0 %167 }
 0x179   :  { %v169_v57 = vmul.f32 %v168_v56, %v1080_v31 }
 0x17b   :  { %v170_v58 = vadd.f32 1e-05, %v169_v57 }
 0x17c   :  { %v111_v13 = vpop.xlane.xlu1 %110 }
 0x17d   :  { %919 = vrsqrt.f32 %v170_v58  ;;  %vm177_vm6 = vweird.f32 %v170_v58  ;;  %v112_v14 = vmul.f32 %v111_v13, %v1083_v34 }
 0x17f   :  { %v113_v15 = vadd.f32 1e-05, %v112_v14 }
 0x181   :  { %921 = vrsqrt.f32 %v113_v15  ;;  %vm120_vm8 = vweird.f32 %v113_v15 }
 0x183   :  { %v920_v59 = vpop.eup %919 }
 0x184   :  { %v172_v60 = vmul.f32 %v920_v59, %v170_v58  ;;  %vm178_vm5 = vweird.f32 %v920_v59 }
 0x185   :  { %vm179_vm7 = vmor %vm177_vm6, %vm178_vm5 }
 0x186   :  { %v173_v61 = vmul.f32 %v920_v59, %v172_v60 }
 0x187   :  { %v922_v16 = vpop.eup %921 }
 0x188   :  { %v174_v62 = vmul.f32 0.5, %v173_v61  ;;  %v115_v17 = vmul.f32 %v922_v16, %v113_v15  ;;  %vm121_vm9 = vweird.f32 %v922_v16 }
 0x189   :  { %vm122_vm10 = vmor %vm120_vm8, %vm121_vm9 }
 0x18a   :  { %v175_v63 = vsub.f32 1.5, %v174_v62  ;;  %v116_v18 = vmul.f32 %v922_v16, %v115_v17 }
 0x18c   :  { %v176_v0 = vmul.f32 %v920_v59, %v175_v63  ;;  %v117_v19 = vmul.f32 0.5, %v116_v18 }
 0x18e   :  { %v180_v4 = vsel %vm179_vm7, %v920_v59, %v176_v0  ;;  %v118_v22 = vsub.f32 1.5, %v117_v19 }
 0x18f   :  { %v181_v6 = vmul.f32 %v180_v4, %v1085_v35  ;;  %v1285_v4 = vld [vmem:[%s1473_s6 + $0x7] ss:$0 sm:$0xff] }
 0x190   :  { %v119_v23 = vmul.f32 %v922_v16, %v118_v22 }
 0x191   :  { %v183_v11 = vmul.f32 %v1239_v2, %v181_v6 }
 0x192   :  { %v123_v24 = vsel %vm122_vm10, %v922_v16, %v119_v23 }
 0x193   :  { %v185_v12 = vadd.f32 %v1247_v10, %v183_v11  ;;  %v124_v26 = vmul.f32 %v123_v24, %v1090_v39 }
 0x195   :  { %203 = vmatmul.f32.vlgmr.msrb.gmra.mxu2 %v185_v12  ;;  %v126_v28 = vmul.f32 %v905_v25, %v124_v26  ;;  %v1290_v12 = vld [vmem:[%s1473_s6 + $0x8] ss:$0 sm:$0xff] }
 0x196   :  { %745 = vmatpush.msrb.mxu2 %v1009_v1 }
 0x197   :  { %v1274_v32 = vadd.f32 %v906_v27, %v126_v28 }
 0x198   :  { %746 = vmatpush.msrb.mxu2 %v1018_v3 }
 0x19a   :  { %747 = vmatpush.msrb.mxu2 %v1026_v5 }
 0x19c   :  { %748 = vmatpush.msrb.mxu2 %v1034_v7 }
 0x218   :  { %v204_v30 = vpop.f32.mrf.mxu2 }
 0x219   :  { %v205_v33 = vadd.f32 %v1272_v29, %v204_v30 }
 0x21b   :  { %v207_v35 = vadd.f32 %v205_v33, %v1274_v32 }
 0x21d   :  { %v208_v36 = vsel %vm95_vm2, %v207_v35, 0.0 }
 0x21e   :  { %209 = vadd.xlane.f32.xlu2 %v208_v36 }
 0x291   :  { %v210_v37 = vpop.xlane.xlu2 %209 }
 0x292   :  { %v211_v38 = vmul.f32 %v210_v37, %v1083_v34  ;;  %v1302_v37 = vld [vmem:[%s1473_s6 + $0x9] ss:$0 sm:$0xff] }
 0x294   :  { %v212_v39 = vsub.f32 %v207_v35, %v211_v38 }
 0x296   :  { %v213_v40 = vmul.f32 %v212_v39, %v212_v39 }
 0x298   :  { %v214_v41 = vsel %vm95_vm2, %v213_v40, 0.0  ;;  %v1307_v40 = vld [vmem:[%s1473_s6 + $0xa] ss:$0 sm:$0xff] }
 0x299   :  { %215 = vadd.xlane.f32.xlu2 %v214_v41 }
 0x30c   :  { %v216_v56 = vpop.xlane.xlu2 %215 }
 0x30d   :  { %v217_v57 = vmul.f32 %v216_v56, %v1083_v34 }
 0x30f   :  { %v218_v58 = vadd.f32 1e-05, %v217_v57 }
 0x311   :  { %923 = vrsqrt.f32 %v218_v58  ;;  %vm225_vm12 = vweird.f32 %v218_v58 }
 0x317   :  { %v924_v59 = vpop.eup %923 }
 0x318   :  { %v220_v60 = vmul.f32 %v924_v59, %v218_v58  ;;  %vm226_vm11 = vweird.f32 %v924_v59 }
 0x319   :  { %vm227_vm13 = vmor %vm225_vm12, %vm226_vm11 }
 0x31a   :  { %v221_v61 = vmul.f32 %v924_v59, %v220_v60 }
 0x31c   :  { %v222_v62 = vmul.f32 0.5, %v221_v61 }
 0x31e   :  { %v223_v63 = vsub.f32 1.5, %v222_v62 }
 0x320   :  { %v224_v0 = vmul.f32 %v924_v59, %v223_v63 }
 0x322   :  { %v228_v6 = vsel %vm227_vm13, %v924_v59, %v224_v0 }
 0x323   :  { %v229_v11 = vmul.f32 %v228_v6, %v212_v39 }
 0x325   :  { %v231_v13 = vmul.f32 %v1285_v4, %v229_v11 }
 0x327   :  { %v233_v14 = vadd.f32 %v1290_v12, %v231_v13 }
 0x329   :  { %v234_v15 = vadd.f32 %v233_v14, %v1040_v8 }
 0x32b   :  { %v235_v16 = vmax.f32 %v234_v15, 0.0 }
 0x32d   :  { %v236_v17 = vsel %vm95_vm2, %v235_v16, 0.0 }
 0x32e   :  { %237 = vadd.xlane.f32.xlu0 %v236_v17 }
 0x3a1   :  { %v238_v18 = vpop.xlane.xlu0 %237 }
 0x3a2   :  { %v239_v19 = vmul.f32 %v238_v18, %v1083_v34 }
 0x3a4   :  { %v240_v22 = vsub.f32 %v235_v16, %v239_v19 }
 0x3a6   :  { %v241_v23 = vmul.f32 %v240_v22, %v240_v22 }
 0x3a8   :  { %v242_v24 = vsel %vm95_vm2, %v241_v23, 0.0 }
 0x3a9   :  { %243 = vadd.xlane.f32.xlu1 %v242_v24 }
 0x41c   :  { %v244_v25 = vpop.xlane.xlu1 %243 }
 0x41d   :  { %v245_v26 = vmul.f32 %v244_v25, %v1083_v34 }
 0x41f   :  { %v246_v27 = vadd.f32 1e-05, %v245_v26 }
 0x421   :  { %925 = vrsqrt.f32 %v246_v27  ;;  %vm253_vm15 = vweird.f32 %v246_v27 }
 0x427   :  { %v926_v28 = vpop.eup %925 }
 0x428   :  { %v248_v30 = vmul.f32 %v926_v28, %v246_v27  ;;  %vm254_vm14 = vweird.f32 %v926_v28 }
 0x429   :  { %vm255_vm0 = vmor %vm253_vm15, %vm254_vm14 }
 0x42a   :  { %v249_v8 = vmul.f32 %v926_v28, %v248_v30 }
 0x42c   :  { %v250_v33 = vmul.f32 0.5, %v249_v8 }
 0x42e   :  { %v251_v35 = vsub.f32 1.5, %v250_v33 }
 0x430   :  { %v252_v36 = vmul.f32 %v926_v28, %v251_v35 }
 0x432   :  { %v256_v38 = vsel %vm255_vm0, %v926_v28, %v252_v36 }
 0x433   :  { %v257_v39 = vmul.f32 %v256_v38, %v240_v22 }
 0x435   :  { %v259_v41 = vmul.f32 %v1302_v37, %v257_v39 }
 0x437   :  { %v261_v56 = vadd.f32 %v1307_v40, %v259_v41 }
 0x439   :  { %892 = vmatmul.msk.f32.vlgmr.msrb.gmra.mxu1 %vm95_vm2, %v261_v56 }
 0x43a   :  { %511 = vmatpush.msrb.mxu1 %v1009_v1 }
 0x43c   :  { %512 = vmatpush.msrb.mxu1 %v1018_v3 }
 0x43e   :  { %513 = vmatpush.msrb.mxu1 %v1026_v5 }
 0x440   :  { %514 = vmatpush.msrb.mxu1 %v1034_v7 }
 0x4b6   :  { %v282_v57 = vpop.f32.mrf.mxu1 }
 0x4b7   :  { %v283_v58 = vadd.f32 %v1057_v9, %v282_v57 }
 0x4b9   :  { %v285_v59 = vmax.f32 %v283_v58, 0.0 }
 0x4bb   :  { %286 = vadd.xlane.f32.xlu2 %v285_v59 }
 0x52e   :  { %v287_v60 = vpop.xlane.xlu2 %286 }
 0x52f   :  { %v288_v61 = vmul.f32 %v287_v60, %v1080_v31 }
 0x531   :  { %v289_v62 = vsub.f32 %v285_v59, %v288_v61 }
 0x533   :  { %v290_v63 = vmul.f32 %v289_v62, %v289_v62 }
 0x535   :  { %291 = vadd.xlane.f32.xlu0 %v290_v63 }
 0x5a8   :  { %v292_v0 = vpop.xlane.xlu0 %291 }
 0x5a9   :  { %v293_v1 = vmul.f32 %v292_v0, %v1080_v31 }
 0x5ab   :  { %v294_v6 = vadd.f32 1e-05, %v293_v1 }
 0x5ad   :  { %927 = vrsqrt.f32 %v294_v6  ;;  %vm301_vm3 = vweird.f32 %v294_v6 }
 0x5b3   :  { %v928_v3 = vpop.eup %927 }
 0x5b4   :  { %v296_v5 = vmul.f32 %v928_v3, %v294_v6  ;;  %vm302_vm1 = vweird.f32 %v928_v3 }
 0x5b5   :  { %vm303_vm4 = vmor %vm301_vm3, %vm302_vm1 }
 0x5b6   :  { %v297_v11 = vmul.f32 %v928_v3, %v296_v5 }
 0x5b8   :  { %v298_v7 = vmul.f32 0.5, %v297_v11 }
 0x5ba   :  { %v299_v13 = vsub.f32 1.5, %v298_v7 }
 0x5bc   :  { %v300_v14 = vmul.f32 %v928_v3, %v299_v13 }
 0x5be   :  { %v304_v15 = vsel %vm303_vm4, %v928_v3, %v300_v14 }
 0x5bf   :  { %v305_v16 = vmul.f32 %v304_v15, %v289_v62 }
 0x5c1   :  { %v306_v17 = vmul.f32 %v1239_v2, %v305_v16 }
 0x5c3   :  { %v307_v18 = vadd.f32 %v1247_v10, %v306_v17 }
 0x5c5   :  { %324 = vmatmul.f32.vlgmr.msra.gmra.mxu0 %v307_v18 }
 0x642   :  { %v325_v19 = vpop.f32.mrf.mxu0 }
 0x643   :  { %v326_v22 = vadd.f32 %v1272_v29, %v325_v19 }
 0x645   :  { %v328_v23 = vadd.f32 %v326_v22, %v1274_v32 }
 0x647   :  { %v329_v24 = vsel %vm95_vm2, %v328_v23, 0.0 }
 0x648   :  { %330 = vadd.xlane.f32.xlu1 %v329_v24 }
 0x6bb   :  { %v331_v25 = vpop.xlane.xlu1 %330 }
 0x6bc   :  { %v332_v26 = vmul.f32 %v331_v25, %v1083_v34 }
 0x6be   :  { %v333_v27 = vsub.f32 %v328_v23, %v332_v26 }
 0x6c0   :  { %v334_v28 = vmul.f32 %v333_v27, %v333_v27 }
 0x6c2   :  { %v335_v30 = vsel %vm95_vm2, %v334_v28, 0.0 }
 0x6c3   :  { %336 = vadd.xlane.f32.xlu2 %v335_v30 }
 0x736   :  { %v337_v8 = vpop.xlane.xlu2 %336 }
 0x737   :  { %v338_v33 = vmul.f32 %v337_v8, %v1083_v34 }
 0x739   :  { %v339_v35 = vadd.f32 1e-05, %v338_v33 }
 0x73b   :  { %929 = vrsqrt.f32 %v339_v35  ;;  %vm346_vm6 = vweird.f32 %v339_v35 }
 0x741   :  { %v930_v36 = vpop.eup %929 }
 0x742   :  { %v341_v38 = vmul.f32 %v930_v36, %v339_v35  ;;  %vm347_vm5 = vweird.f32 %v930_v36 }
 0x743   :  { %vm348_vm7 = vmor %vm346_vm6, %vm347_vm5 }
 0x744   :  { %v342_v39 = vmul.f32 %v930_v36, %v341_v38 }
 0x746   :  { %v343_v41 = vmul.f32 0.5, %v342_v39 }
 0x748   :  { %v344_v57 = vsub.f32 1.5, %v343_v41 }
 0x74a   :  { %v345_v58 = vmul.f32 %v930_v36, %v344_v57 }
 0x74c   :  { %v349_v59 = vsel %vm348_vm7, %v930_v36, %v345_v58 }
 0x74d   :  { %v350_v60 = vmul.f32 %v349_v59, %v333_v27 }
 0x74f   :  { %v351_v61 = vmul.f32 %v1285_v4, %v350_v60 }
 0x751   :  { %v352_v62 = vadd.f32 %v1290_v12, %v351_v61 }
 0x753   :  { %v353_v63 = vadd.f32 %v352_v62, %v261_v56 }
 0x755   :  { %v354_v0 = vmax.f32 %v353_v63, 0.0 }
 0x757   :  { %v355_v1 = vsel %vm95_vm2, %v354_v0, 0.0 }
 0x758   :  { %356 = vadd.xlane.f32.xlu0 %v355_v1 }
 0x7cb   :  { %v357_v6 = vpop.xlane.xlu0 %356 }
 0x7cc   :  { %v358_v3 = vmul.f32 %v357_v6, %v1083_v34 }
 0x7ce   :  { %v359_v5 = vsub.f32 %v354_v0, %v358_v3 }
 0x7d0   :  { %v360_v11 = vmul.f32 %v359_v5, %v359_v5 }
 0x7d2   :  { %v361_v7 = vsel %vm95_vm2, %v360_v11, 0.0 }
 0x7d3   :  { %362 = vadd.xlane.f32.xlu1 %v361_v7 }
 0x846   :  { %v363_v13 = vpop.xlane.xlu1 %362 }
 0x847   :  { %v364_v14 = vmul.f32 %v363_v13, %v1083_v34 }
 0x849   :  { %v365_v15 = vadd.f32 1e-05, %v364_v14 }
 0x84b   :  { %931 = vrsqrt.f32 %v365_v15  ;;  %vm372_vm9 = vweird.f32 %v365_v15 }
 0x851   :  { %v932_v16 = vpop.eup %931 }
 0x852   :  { %v367_v17 = vmul.f32 %v932_v16, %v365_v15  ;;  %vm373_vm8 = vweird.f32 %v932_v16 }
 0x853   :  { %vm374_vm10 = vmor %vm372_vm9, %vm373_vm8 }
 0x854   :  { %v368_v56 = vmul.f32 %v932_v16, %v367_v17 }
 0x856   :  { %v369_v18 = vmul.f32 0.5, %v368_v56 }
 0x858   :  { %v370_v19 = vsub.f32 1.5, %v369_v18 }
 0x85a   :  { %v371_v22 = vmul.f32 %v932_v16, %v370_v19 }
 0x85c   :  { %v375_v23 = vsel %vm374_vm10, %v932_v16, %v371_v22 }
 0x85d   :  { %v376_v24 = vmul.f32 %v375_v23, %v359_v5 }
 0x85f   :  { %v377_v25 = vmul.f32 %v1302_v37, %v376_v24 }
 0x861   :  { %v1335_v26 = vadd.f32 %v1307_v40, %v377_v25 }
 0x863   :  { %893 = vmatmul.msk.f32.vlgmr.msra.gmra.mxu1 %vm95_vm2, %v1335_v26 }
 0x864   :  { %542 = vmatpush.msra.mxu1 %v1067_v20 }
 0x866   :  { %543 = vmatpush.msra.mxu1 %v1072_v21 }
 0x868   :  { %544 = vmatpush.msra.mxu1 %v1098_v42 }
 0x86a   :  { %545 = vmatpush.msra.mxu1 %v1105_v43 }
 0x86c   :  { %546 = vmatpush.msra.mxu1 %v1113_v44 }
 0x86e   :  { %547 = vmatpush.msra.mxu1 %v1121_v45 }
 0x870   :  { %548 = vmatpush.msra.mxu1 %v1129_v46 }
 0x872   :  { %549 = vmatpush.msra.mxu1 %v1137_v47 }
 0x874   :  { %550 = vmatpush.msra.mxu1 %v1145_v48 }
 0x876   :  { %551 = vmatpush.msra.mxu1 %v1153_v49 }
 0x878   :  { %552 = vmatpush.msra.mxu1 %v1161_v50 }
 0x87a   :  { %553 = vmatpush.msra.mxu1 %v1169_v51 }
 0x87c   :  { %554 = vmatpush.msra.mxu1 %v1177_v52 }
 0x87e   :  { %555 = vmatpush.msra.mxu1 %v1185_v53 }
 0x880   :  { %556 = vmatpush.msra.mxu1 %v1193_v54 }
 0x882   :  { %557 = vmatpush.msra.mxu1 %v1201_v55 }
 0x8e0   :  { %v399_v20 = vpop.f32.mrf.mxu1 }
 0x8e1   :  { %v400_v21 = vadd.f32 %v1057_v9, %v399_v20 }
 0x8e3   :  { %v402_v42 = vmax.f32 %v400_v21, 0.0 }
 0x8e5   :  { %403 = vadd.xlane.f32.xlu2 %v402_v42 }
 0x958   :  { %v404_v43 = vpop.xlane.xlu2 %403 }
 0x959   :  { %v405_v44 = vmul.f32 %v404_v43, %v1080_v31 }
 0x95b   :  { %v406_v45 = vsub.f32 %v402_v42, %v405_v44 }
 0x95d   :  { %v407_v46 = vmul.f32 %v406_v45, %v406_v45 }
 0x95f   :  { %408 = vadd.xlane.f32.xlu0 %v407_v46 }
 0x9d2   :  { %v409_v47 = vpop.xlane.xlu0 %408 }
 0x9d3   :  { %v410_v48 = vmul.f32 %v409_v47, %v1080_v31 }
 0x9d5   :  { %v411_v49 = vadd.f32 1e-05, %v410_v48 }
 0x9d7   :  { %933 = vrsqrt.f32 %v411_v49  ;;  %vm418_vm12 = vweird.f32 %v411_v49 }
 0x9dd   :  { %v934_v50 = vpop.eup %933 }
 0x9de   :  { %v413_v51 = vmul.f32 %v934_v50, %v411_v49  ;;  %vm419_vm11 = vweird.f32 %v934_v50 }
 0x9df   :  { %vm420_vm13 = vmor %vm418_vm12, %vm419_vm11 }
 0x9e0   :  { %v414_v52 = vmul.f32 %v934_v50, %v413_v51 }
 0x9e2   :  { %v415_v53 = vmul.f32 0.5, %v414_v52 }
 0x9e4   :  { %v416_v54 = vsub.f32 1.5, %v415_v53 }
 0x9e6   :  { %v417_v55 = vmul.f32 %v934_v50, %v416_v54 }
 0x9e8   :  { %v421_v27 = vsel %vm420_vm13, %v934_v50, %v417_v55 }
 0x9e9   :  { %v422_v28 = vmul.f32 %v421_v27, %v406_v45 }
 0x9eb   :  { %v423_v30 = vmul.f32 %v1239_v2, %v422_v28 }
 0x9ed   :  { %v424_v8 = vadd.f32 %v1247_v10, %v423_v30 }
 0x9ef   :  { %441 = vmatmul.f32.vlgmr.msra.gmra.mxu3 %v424_v8 }
 0xa72   :  { %v442_v33 = vpop.f32.mrf.mxu3 }
 0xa73   :  { %v443_v35 = vadd.f32 %v1272_v29, %v442_v33 }
 0xa75   :  { %v445_v36 = vadd.f32 %v443_v35, %v1274_v32 }
 0xa77   :  { %v446_v38 = vsel %vm95_vm2, %v445_v36, 0.0 }
 0xa78   :  { %447 = vadd.xlane.f32.xlu1 %v446_v38 }
 0xaeb   :  { %v448_v39 = vpop.xlane.xlu1 %447 }
 0xaec   :  { %v449_v41 = vmul.f32 %v448_v39, %v1083_v34 }
 0xaee   :  { %v450_v57 = vsub.f32 %v445_v36, %v449_v41 }
 0xaf0   :  { %v451_v58 = vmul.f32 %v450_v57, %v450_v57 }
 0xaf2   :  { %v452_v59 = vsel %vm95_vm2, %v451_v58, 0.0 }
 0xaf3   :  { %453 = vadd.xlane.f32.xlu2 %v452_v59 }
 0xb66   :  { %v454_v60 = vpop.xlane.xlu2 %453 }
 0xb67   :  { %v455_v61 = vmul.f32 %v454_v60, %v1083_v34 }
 0xb69   :  { %v456_v62 = vadd.f32 1e-05, %v455_v61 }
 0xb6b   :  { %935 = vrsqrt.f32 %v456_v62  ;;  %vm463_vm15 = vweird.f32 %v456_v62 }
 0xb71   :  { %v936_v63 = vpop.eup %935 }
 0xb72   :  { %v458_v0 = vmul.f32 %v936_v63, %v456_v62  ;;  %vm464_vm14 = vweird.f32 %v936_v63 }
 0xb73   :  { %vm465_vm0 = vmor %vm463_vm15, %vm464_vm14 }
 0xb74   :  { %v459_v1 = vmul.f32 %v936_v63, %v458_v0 }
 0xb76   :  { %v460_v6 = vmul.f32 0.5, %v459_v1 }
 0xb78   :  { %v461_v3 = vsub.f32 1.5, %v460_v6 }
 0xb7a   :  { %v462_v5 = vmul.f32 %v936_v63, %v461_v3 }
 0xb7c   :  { %v466_v11 = vsel %vm465_vm0, %v936_v63, %v462_v5 }
 0xb7d   :  { %v467_v7 = vmul.f32 %v466_v11, %v450_v57 }
 0xb7f   :  { %v468_v13 = vmul.f32 %v1285_v4, %v467_v7 }
 0xb81   :  { %v469_v14 = vadd.f32 %v1290_v12, %v468_v13 }
 0xb83   :  { %v470_v15 = vadd.f32 %v469_v14, %v1335_v26 }
 0xb85   :  { %v471_v16 = vmax.f32 %v470_v15, 0.0 }
 0xb87   :  { %v472_v17 = vsel %vm95_vm2, %v471_v16, 0.0 }
 0xb88   :  { %473 = vadd.xlane.f32.xlu0 %v472_v17 }
 0xbfb   :  { %v474_v56 = vpop.xlane.xlu0 %473 }
 0xbfc   :  { %v475_v18 = vmul.f32 %v474_v56, %v1083_v34 }
 0xbfe   :  { %v476_v19 = vsub.f32 %v471_v16, %v475_v18 }
 0xc00   :  { %v477_v22 = vmul.f32 %v476_v19, %v476_v19 }
 0xc02   :  { %v478_v23 = vsel %vm95_vm2, %v477_v22, 0.0 }
 0xc03   :  { %479 = vadd.xlane.f32.xlu1 %v478_v23 }
 0xc76   :  { %v480_v24 = vpop.xlane.xlu1 %479 }
 0xc77   :  { %v481_v25 = vmul.f32 %v480_v24, %v1083_v34 }
 0xc79   :  { %v482_v20 = vadd.f32 1e-05, %v481_v25 }
 0xc7b   :  { %937 = vrsqrt.f32 %v482_v20  ;;  %vm489_vm3 = vweird.f32 %v482_v20 }
 0xc81   :  { %v938_v21 = vpop.eup %937 }
 0xc82   :  { %v484_v42 = vmul.f32 %v938_v21, %v482_v20  ;;  %vm490_vm1 = vweird.f32 %v938_v21 }
 0xc83   :  { %vm491_vm4 = vmor %vm489_vm3, %vm490_vm1 }
 0xc84   :  { %v485_v26 = vmul.f32 %v938_v21, %v484_v42 }
 0xc86   :  { %v486_v43 = vmul.f32 0.5, %v485_v26 }
 0xc88   :  { %v487_v44 = vsub.f32 1.5, %v486_v43 }
 0xc8a   :  { %v488_v45 = vmul.f32 %v938_v21, %v487_v44 }
 0xc8c   :  { %v492_v46 = vsel %vm491_vm4, %v938_v21, %v488_v45 }
 0xc8d   :  { %v493_v47 = vmul.f32 %v492_v46, %v476_v19 }
 0xc8f   :  { %v494_v48 = vmul.f32 %v1302_v37, %v493_v47 }
 0xc91   :  { %v495_v49 = vadd.f32 %v1307_v40, %v494_v48 }
 0xc93   :  { %894 = vmatmul.msk.f32.vlgmr.msrb.gmra.mxu1 %vm95_vm2, %v495_v49 }
 0xd10   :  { %v516_v50 = vpop.f32.mrf.mxu1 }
 0xd11   :  { %v517_v51 = vadd.f32 %v1057_v9, %v516_v50 }
 0xd13   :  { %v519_v52 = vmax.f32 %v517_v51, 0.0 }
 0xd15   :  { %520 = vadd.xlane.f32.xlu2 %v519_v52 }
 0xd88   :  { %v521_v53 = vpop.xlane.xlu2 %520 }
 0xd89   :  { %v522_v54 = vmul.f32 %v521_v53, %v1080_v31 }
 0xd8b   :  { %v523_v55 = vsub.f32 %v519_v52, %v522_v54 }
 0xd8d   :  { %v524_v27 = vmul.f32 %v523_v55, %v523_v55 }
 0xd8f   :  { %525 = vadd.xlane.f32.xlu0 %v524_v27 }
 0xe02   :  { %v526_v28 = vpop.xlane.xlu0 %525 }
 0xe03   :  { %v527_v30 = vmul.f32 %v526_v28, %v1080_v31 }
 0xe05   :  { %v528_v8 = vadd.f32 1e-05, %v527_v30 }
 0xe07   :  { %939 = vrsqrt.f32 %v528_v8  ;;  %vm535_vm6 = vweird.f32 %v528_v8 }
 0xe0d   :  { %v940_v33 = vpop.eup %939 }
 0xe0e   :  { %v530_v35 = vmul.f32 %v940_v33, %v528_v8  ;;  %vm536_vm5 = vweird.f32 %v940_v33 }
 0xe0f   :  { %vm537_vm7 = vmor %vm535_vm6, %vm536_vm5 }
 0xe10   :  { %v531_v36 = vmul.f32 %v940_v33, %v530_v35 }
 0xe12   :  { %v532_v38 = vmul.f32 0.5, %v531_v36 }
 0xe14   :  { %v533_v39 = vsub.f32 1.5, %v532_v38 }
 0xe16   :  { %v534_v9 = vmul.f32 %v940_v33, %v533_v39 }
 0xe18   :  { %v538_v41 = vsel %vm537_vm7, %v940_v33, %v534_v9  ;;  %v1399_v33 = vld [vmem:[%s1473_s6] ss:$0 sm:$0xff] }
 0xe19   :  { %v539_v57 = vmul.f32 %v538_v41, %v523_v55 }
 0xe1b   :  { %v540_v58 = vmul.f32 %v1239_v2, %v539_v57 }
 0xe1d   :  { %v541_v59 = vadd.f32 %v1247_v10, %v540_v58 }
 0xe1f   :  { %558 = vmatmul.f32.vlgmr.msra.gmra.mxu1 %v541_v59 }
 0xe9c   :  { %v559_v60 = vpop.f32.mrf.mxu1 }
 0xe9d   :  { %v560_v61 = vadd.f32 %v1272_v29, %v559_v60 }
 0xe9f   :  { %v562_v62 = vadd.f32 %v560_v61, %v1274_v32 }
 0xea1   :  { %v563_v63 = vsel %vm95_vm2, %v562_v62, 0.0 }
 0xea2   :  { %564 = vadd.xlane.f32.xlu1 %v563_v63 }
 0xf15   :  { %v565_v0 = vpop.xlane.xlu1 %564 }
 0xf16   :  { %v566_v1 = vmul.f32 %v565_v0, %v1083_v34 }
 0xf18   :  { %v567_v6 = vsub.f32 %v562_v62, %v566_v1 }
 0xf1a   :  { %v568_v3 = vmul.f32 %v567_v6, %v567_v6 }
 0xf1c   :  { %v569_v5 = vsel %vm95_vm2, %v568_v3, 0.0 }
 0xf1d   :  { %570 = vadd.xlane.f32.xlu2 %v569_v5 }
 0xf90   :  { %v571_v11 = vpop.xlane.xlu2 %570 }
 0xf91   :  { %v572_v7 = vmul.f32 %v571_v11, %v1083_v34 }
 0xf93   :  { %v573_v13 = vadd.f32 1e-05, %v572_v7 }
 0xf95   :  { %941 = vrsqrt.f32 %v573_v13  ;;  %vm580_vm9 = vweird.f32 %v573_v13 }
 0xf9b   :  { %v942_v14 = vpop.eup %941 }
 0xf9c   :  { %v575_v15 = vmul.f32 %v942_v14, %v573_v13  ;;  %vm581_vm8 = vweird.f32 %v942_v14 }
 0xf9d   :  { %vm582_vm10 = vmor %vm580_vm9, %vm581_vm8 }
 0xf9e   :  { %v576_v16 = vmul.f32 %v942_v14, %v575_v15 }
 0xfa0   :  { %v577_v17 = vmul.f32 0.5, %v576_v16 }
 0xfa2   :  { %v578_v56 = vsub.f32 1.5, %v577_v17 }
 0xfa4   :  { %v579_v18 = vmul.f32 %v942_v14, %v578_v56 }
 0xfa6   :  { %v583_v19 = vsel %vm582_vm10, %v942_v14, %v579_v18 }
 0xfa7   :  { %v584_v22 = vmul.f32 %v583_v19, %v567_v6 }
 0xfa9   :  { %v585_v23 = vmul.f32 %v1285_v4, %v584_v22 }
 0xfab   :  { %v586_v24 = vadd.f32 %v1290_v12, %v585_v23 }
 0xfad   :  { %v587_v25 = vadd.f32 %v586_v24, %v495_v49 }
 0xfaf   :  { %v588_v20 = vmax.f32 %v587_v25, 0.0 }
 0xfb1   :  { %v589_v21 = vsel %vm95_vm2, %v588_v20, 0.0 }
 0xfb2   :  { %590 = vadd.xlane.f32.xlu0 %v589_v21 }
0x1025   :  { %v591_v42 = vpop.xlane.xlu0 %590 }
0x1026   :  { %v592_v26 = vmul.f32 %v591_v42, %v1083_v34 }
0x1028   :  { %v593_v43 = vsub.f32 %v588_v20, %v592_v26 }
0x102a   :  { %v594_v44 = vmul.f32 %v593_v43, %v593_v43 }
0x102c   :  { %v595_v45 = vsel %vm95_vm2, %v594_v44, 0.0 }
0x102d   :  { %596 = vadd.xlane.f32.xlu1 %v595_v45 }
0x10a0   :  { %v597_v46 = vpop.xlane.xlu1 %596 }
0x10a1   :  { %v598_v47 = vmul.f32 %v597_v46, %v1083_v34 }
0x10a3   :  { %v599_v48 = vadd.f32 1e-05, %v598_v47 }
0x10a5   :  { %943 = vrsqrt.f32 %v599_v48  ;;  %vm606_vm12 = vweird.f32 %v599_v48 }
0x10ab   :  { %v944_v50 = vpop.eup %943 }
0x10ac   :  { %v601_v51 = vmul.f32 %v944_v50, %v599_v48  ;;  %vm607_vm11 = vweird.f32 %v944_v50 }
0x10ad   :  { %vm608_vm13 = vmor %vm606_vm12, %vm607_vm11 }
0x10ae   :  { %v602_v49 = vmul.f32 %v944_v50, %v601_v51 }
0x10b0   :  { %v603_v52 = vmul.f32 0.5, %v602_v49 }
0x10b2   :  { %v604_v53 = vsub.f32 1.5, %v603_v52 }
0x10b4   :  { %v605_v54 = vmul.f32 %v944_v50, %v604_v53 }
0x10b6   :  { %v609_v55 = vsel %vm608_vm13, %v944_v50, %v605_v54 }
0x10b7   :  { %v610_v27 = vmul.f32 %v609_v55, %v593_v43 }
0x10b9   :  { %v611_v28 = vmul.f32 %v1302_v37, %v610_v27 }
0x10bb   :  { %v612_v30 = vadd.f32 %v1307_v40, %v611_v28 }
0x10bd   :  { %895 = vmatmul.msk.f32.vlgmr.msra.gmra.mxu2 %vm95_vm2, %v612_v30 }
0x1140   :  { %v633_v8 = vpop.f32.mrf.mxu2 }
0x1141   :  { %v634_v35 = vadd.f32 %v1399_v33, %v633_v8 }
0x1143   :  { %v636_v36 = vmax.f32 %v634_v35, 0.0 }
0x1145   :  { %637 = vadd.xlane.f32.xlu2 %v636_v36 }
0x11b8   :  { %v638_v38 = vpop.xlane.xlu2 %637 }
0x11b9   :  { %v639_v39 = vmul.f32 %v638_v38, %v1080_v31 }
0x11bb   :  { %v640_v9 = vsub.f32 %v636_v36, %v639_v39 }
0x11bd   :  { %v641_v41 = vmul.f32 %v640_v9, %v640_v9 }
0x11bf   :  { %642 = vadd.xlane.f32.xlu0 %v641_v41 }
0x1232   :  { %v643_v57 = vpop.xlane.xlu0 %642 }
0x1233   :  { %v644_v58 = vmul.f32 %v643_v57, %v1080_v31 }
0x1235   :  { %v645_v59 = vadd.f32 1e-05, %v644_v58 }
0x1237   :  { %945 = vrsqrt.f32 %v645_v59  ;;  %vm652_vm15 = vweird.f32 %v645_v59 }
0x123d   :  { %v946_v60 = vpop.eup %945 }
0x123e   :  { %v647_v61 = vmul.f32 %v946_v60, %v645_v59  ;;  %vm653_vm14 = vweird.f32 %v946_v60 }
0x123f   :  { %vm654_vm0 = vmor %vm652_vm15, %vm653_vm14 }
0x1240   :  { %v648_v62 = vmul.f32 %v946_v60, %v647_v61 }
0x1242   :  { %v649_v63 = vmul.f32 0.5, %v648_v62 }
0x1244   :  { %v650_v0 = vsub.f32 1.5, %v649_v63 }
0x1246   :  { %v651_v1 = vmul.f32 %v946_v60, %v650_v0 }
0x1248   :  { %v655_v6 = vsel %vm654_vm0, %v946_v60, %v651_v1 }
0x1249   :  { %v656_v3 = vmul.f32 %v655_v6, %v640_v9 }
0x124b   :  { %v657_v5 = vmul.f32 %v1239_v2, %v656_v3 }
0x124d   :  { %v658_v11 = vadd.f32 %v1247_v10, %v657_v5 }
0x124f   :  { %675 = vmatmul.f32.vlgmr.msrb.gmra.mxu0 %v658_v11 }
0x12cc   :  { %v676_v7 = vpop.f32.mrf.mxu0 }
0x12cd   :  { %v677_v13 = vadd.f32 %v1272_v29, %v676_v7 }
0x12cf   :  { %v679_v14 = vadd.f32 %v677_v13, %v1274_v32 }
0x12d1   :  { %v680_v15 = vsel %vm95_vm2, %v679_v14, 0.0 }
0x12d2   :  { %681 = vadd.xlane.f32.xlu1 %v680_v15 }
0x1345   :  { %v682_v16 = vpop.xlane.xlu1 %681 }
0x1346   :  { %v683_v17 = vmul.f32 %v682_v16, %v1083_v34 }
0x1348   :  { %v684_v56 = vsub.f32 %v679_v14, %v683_v17 }
0x134a   :  { %v685_v18 = vmul.f32 %v684_v56, %v684_v56 }
0x134c   :  { %v686_v19 = vsel %vm95_vm2, %v685_v18, 0.0 }
0x134d   :  { %687 = vadd.xlane.f32.xlu2 %v686_v19 }
0x13c0   :  { %v688_v22 = vpop.xlane.xlu2 %687 }
0x13c1   :  { %v689_v23 = vmul.f32 %v688_v22, %v1083_v34 }
0x13c3   :  { %v690_v24 = vadd.f32 1e-05, %v689_v23 }
0x13c5   :  { %947 = vrsqrt.f32 %v690_v24  ;;  %vm697_vm3 = vweird.f32 %v690_v24 }
0x13cb   :  { %v948_v25 = vpop.eup %947 }
0x13cc   :  { %v692_v20 = vmul.f32 %v948_v25, %v690_v24  ;;  %vm698_vm1 = vweird.f32 %v948_v25 }
0x13cd   :  { %vm699_vm4 = vmor %vm697_vm3, %vm698_vm1  ;;  %vm875_vm1 = vcmask 523520   ;;  %vm881_vm3 = vcmask 654848  }
0x13ce   :  { %v693_v21 = vmul.f32 %v948_v25, %v692_v20 }
0x13d0   :  { %v694_v42 = vmul.f32 0.5, %v693_v21 }
0x13d2   :  { %v695_v26 = vsub.f32 1.5, %v694_v42 }
0x13d4   :  { %v696_v43 = vmul.f32 %v948_v25, %v695_v26 }
0x13d6   :  { %v700_v44 = vsel %vm699_vm4, %v948_v25, %v696_v43  ;;  %vm883_vm4 = vcmask 1048192  }
0x13d7   :  { %v701_v45 = vmul.f32 %v700_v44, %v684_v56 }
0x13d9   :  { %v702_v46 = vmul.f32 %v1285_v4, %v701_v45 }
0x13db   :  { %v703_v47 = vadd.f32 %v1290_v12, %v702_v46 }
0x13dd   :  { %v704_v48 = vadd.f32 %v703_v47, %v612_v30 }
0x13df   :  { %v705_v50 = vmax.f32 %v704_v48, 0.0 }
0x13e1   :  { %v706_v51 = vsel %vm95_vm2, %v705_v50, 0.0 }
0x13e2   :  { %707 = vadd.xlane.f32.xlu0 %v706_v51 }
0x1455   :  { %v708_v49 = vpop.xlane.xlu0 %707 }
0x1456   :  { %v709_v52 = vmul.f32 %v708_v49, %v1083_v34 }
0x1458   :  { %v710_v53 = vsub.f32 %v705_v50, %v709_v52 }
0x145a   :  { %v711_v54 = vmul.f32 %v710_v53, %v710_v53 }
0x145c   :  { %v712_v55 = vsel %vm95_vm2, %v711_v54, 0.0 }
0x145d   :  { %713 = vadd.xlane.f32.xlu1 %v712_v55 }
0x14d0   :  { %v714_v27 = vpop.xlane.xlu1 %713 }
0x14d1   :  { %v715_v28 = vmul.f32 %v714_v27, %v1083_v34 }
0x14d3   :  { %v716_v8 = vadd.f32 1e-05, %v715_v28 }
0x14d5   :  { %949 = vrsqrt.f32 %v716_v8  ;;  %vm723_vm6 = vweird.f32 %v716_v8 }
0x14db   :  { %v950_v35 = vpop.eup %949 }
0x14dc   :  { %v718_v36 = vmul.f32 %v950_v35, %v716_v8  ;;  %vm724_vm5 = vweird.f32 %v950_v35 }
0x14dd   :  { %vm725_vm7 = vmor %vm723_vm6, %vm724_vm5 }
0x14de   :  { %v719_v30 = vmul.f32 %v950_v35, %v718_v36  ;;  %v64_v36 = vld [vmem:[%s1475_s5 + $0x18] sm:$0xff] }
0x14df   :  { %863 = vmatpush.msra.mxu2 %v64_v36 }
0x14e0   :  { %v720_v38 = vmul.f32 0.5, %v719_v30  ;;  %v61_v30 = vld [vmem:[%s1475_s5] sm:$0xff] }
0x14e2   :  { %v721_v39 = vsub.f32 1.5, %v720_v38 }
0x14e4   :  { %v722_v9 = vmul.f32 %v950_v35, %v721_v39 }
0x14e6   :  { %v726_v41 = vsel %vm725_vm7, %v950_v35, %v722_v9 }
0x14e7   :  { %v727_v57 = vmul.f32 %v726_v41, %v710_v53 }
0x14e9   :  { %v728_v58 = vmul.f32 %v1302_v37, %v727_v57 }
0x14eb   :  { %v729_v59 = vadd.f32 %v1307_v40, %v728_v58 }
0x14ed   :  { %896 = vmatmul.msk.f32.vlgmr.msrb.gmra.mxu2 %vm95_vm2, %v729_v59 }
0x1570   :  { %v750_v60 = vpop.f32.mrf.mxu2 }
0x1571   :  { %v751_v61 = vadd.f32 %v1399_v33, %v750_v60 }
0x1573   :  { %v753_v62 = vmax.f32 %v751_v61, 0.0 }
0x1575   :  { %754 = vadd.xlane.f32.xlu2 %v753_v62 }
0x15e8   :  { %v755_v63 = vpop.xlane.xlu2 %754 }
0x15e9   :  { %v756_v0 = vmul.f32 %v755_v63, %v1080_v31 }
0x15eb   :  { %v757_v1 = vsub.f32 %v753_v62, %v756_v0 }
0x15ed   :  { %v758_v6 = vmul.f32 %v757_v1, %v757_v1 }
0x15ef   :  { %759 = vadd.xlane.f32.xlu0 %v758_v6 }
0x1662   :  { %v760_v3 = vpop.xlane.xlu0 %759 }
0x1663   :  { %v761_v5 = vmul.f32 %v760_v3, %v1080_v31 }
0x1665   :  { %v762_v11 = vadd.f32 1e-05, %v761_v5  ;;  %v962_v5 = vmov 0.0  }
0x1667   :  { %951 = vrsqrt.f32 %v762_v11  ;;  %vm769_vm9 = vweird.f32 %v762_v11 }
0x166d   :  { %v952_v7 = vpop.eup %951 }
0x166e   :  { %v764_v13 = vmul.f32 %v952_v7, %v762_v11  ;;  %vm770_vm8 = vweird.f32 %v952_v7 }
0x166f   :  { %vm771_vm10 = vmor %vm769_vm9, %vm770_vm8 }
0x1670   :  { %v765_v14 = vmul.f32 %v952_v7, %v764_v13 }
0x1672   :  { %v766_v15 = vmul.f32 0.5, %v765_v14 }
0x1674   :  { %v767_v16 = vsub.f32 1.5, %v766_v15 }
0x1676   :  { %v768_v33 = vmul.f32 %v952_v7, %v767_v16 }
0x1678   :  { %v772_v17 = vsel %vm771_vm10, %v952_v7, %v768_v33 }
0x1679   :  { %v773_v56 = vmul.f32 %v772_v17, %v757_v1 }
0x167b   :  { %v774_v18 = vmul.f32 %v1239_v2, %v773_v56 }
0x167d   :  { %v775_v19 = vadd.f32 %v1247_v10, %v774_v18 }
0x167f   :  { %792 = vmatmul.f32.vlgmr.msrb.gmra.mxu3 %v775_v19 }
0x1702   :  { %v793_v22 = vpop.f32.mrf.mxu3 }
0x1703   :  { %v794_v31 = vadd.f32 %v1272_v29, %v793_v22 }
0x1705   :  { %v796_v23 = vadd.f32 %v794_v31, %v1274_v32 }
0x1707   :  { %v797_v24 = vsel %vm95_vm2, %v796_v23, 0.0 }
0x1708   :  { %798 = vadd.xlane.f32.xlu1 %v797_v24 }
0x177b   :  { %v799_v25 = vpop.xlane.xlu1 %798 }
0x177c   :  { %v800_v20 = vmul.f32 %v799_v25, %v1083_v34 }
0x177e   :  { %v801_v21 = vsub.f32 %v796_v23, %v800_v20 }
0x1780   :  { %v802_v42 = vmul.f32 %v801_v21, %v801_v21 }
0x1782   :  { %v803_v26 = vsel %vm95_vm2, %v802_v42, 0.0 }
0x1783   :  { %804 = vadd.xlane.f32.xlu2 %v803_v26 }
0x179b   :  { %872 = vrot.lane.b32.xlu2 %v729_v59, %s960_s1 }
0x17f6   :  { %v805_v2 = vpop.xlane.xlu2 %804 }
0x17f7   :  { %v806_v10 = vmul.f32 %v805_v2, %v1083_v34 }
0x17f9   :  { %v807_v43 = vadd.f32 1e-05, %v806_v10 }
0x17fb   :  { %953 = vrsqrt.f32 %v807_v43  ;;  %vm814_vm12 = vweird.f32 %v807_v43 }
0x17fe   :  { %v873_v6 = vpop.permute.xlu2 %872 }
0x1801   :  { %v954_v29 = vpop.eup %953 }
0x1802   :  { %v809_v32 = vmul.f32 %v954_v29, %v807_v43  ;;  %vm815_vm11 = vweird.f32 %v954_v29 }
0x1803   :  { %vm816_vm13 = vmor %vm814_vm12, %vm815_vm11 }
0x1804   :  { %v810_v44 = vmul.f32 %v954_v29, %v809_v32 }
0x1806   :  { %v811_v45 = vmul.f32 0.5, %v810_v44 }
0x1808   :  { %v812_v46 = vsub.f32 1.5, %v811_v45 }
0x180a   :  { %v813_v47 = vmul.f32 %v954_v29, %v812_v46 }
0x180c   :  { %v817_v48 = vsel %vm816_vm13, %v954_v29, %v813_v47 }
0x180d   :  { %v818_v50 = vmul.f32 %v817_v48, %v801_v21 }
0x180f   :  { %v819_v51 = vmul.f32 %v1285_v4, %v818_v50  ;;  %v63_v4 = vld [vmem:[%s1475_s5 + $0x10] sm:$0xff] }
0x1810   :  { %864 = vmatpush.msra.mxu2 %v63_v4 }
0x1811   :  { %v820_v49 = vadd.f32 %v1290_v12, %v819_v51  ;;  %v62_v12 = vld [vmem:[%s1475_s5 + $0x8] sm:$0xff] }
0x1812   :  { %865 = vmatpush.msra.mxu2 %v62_v12 }
0x1813   :  { %v821_v52 = vadd.f32 %v820_v49, %v729_v59 }
0x1814   :  { %866 = vmatpush.msra.mxu2 %v61_v30 }
0x1815   :  { %v822_v53 = vmax.f32 %v821_v52, 0.0 }
0x1817   :  { %v823_v54 = vsel %vm95_vm2, %v822_v53, 0.0 }
0x1818   :  { %824 = vadd.xlane.f32.xlu0 %v823_v54 }
0x188b   :  { %v825_v55 = vpop.xlane.xlu0 %824 }
0x188c   :  { %v826_v27 = vmul.f32 %v825_v55, %v1083_v34 }
0x188e   :  { %v827_v28 = vsub.f32 %v822_v53, %v826_v27 }
0x1890   :  { %v828_v8 = vmul.f32 %v827_v28, %v827_v28 }
0x1892   :  { %v829_v35 = vsel %vm95_vm2, %v828_v8, 0.0 }
0x1893   :  { %830 = vadd.xlane.f32.xlu1 %v829_v35 }
0x1906   :  { %v831_v38 = vpop.xlane.xlu1 %830 }
0x1907   :  { %v832_v39 = vmul.f32 %v831_v38, %v1083_v34  ;;  %v914_v34 = vld [vmem:[%s1473_s6 + $0xb] ss:$0 sm:$0xff] }
0x1909   :  { %v833_v9 = vadd.f32 1e-05, %v832_v39 }
0x190b   :  { %955 = vrsqrt.f32 %v833_v9  ;;  %vm840_vm15 = vweird.f32 %v833_v9 }
0x1911   :  { %v956_v41 = vpop.eup %955 }
0x1912   :  { %v835_v57 = vmul.f32 %v956_v41, %v833_v9  ;;  %vm841_vm14 = vweird.f32 %v956_v41 }
0x1913   :  { %vm842_vm0 = vmor %vm840_vm15, %vm841_vm14 }
0x1914   :  { %v836_v58 = vmul.f32 %v956_v41, %v835_v57 }
0x1916   :  { %v837_v59 = vmul.f32 0.5, %v836_v58 }
0x1918   :  { %v838_v60 = vsub.f32 1.5, %v837_v59 }
0x191a   :  { %v839_v61 = vmul.f32 %v956_v41, %v838_v60 }
0x191c   :  { %v843_v62 = vsel %vm842_vm0, %v956_v41, %v839_v61 }
0x191d   :  { %v844_v63 = vmul.f32 %v843_v62, %v827_v28 }
0x191f   :  { %v845_v0 = vmul.f32 %v1302_v37, %v844_v63 }
0x1921   :  { %v846_v1 = vadd.f32 %v1307_v40, %v845_v0 }
0x1923   :  { %897 = vmatmul.msk.f32.vlgmr.msra.gmra.mxu2 %vm95_vm2, %v846_v1  ;;  %871 = vst.msk [vmem:[%s1476_s7] sm:$0xff] %vm95_vm2, %v846_v1 }
0x1924   :  { %876 = vst.msk [vmem:[%s1476_s7] sm:$0xff] %vm875_vm1, %v873_v6 }
0x19a6   :  { %v868_v37 = vpop.f32.mrf.mxu2 }
0x19a7   :  { %v869_v3 = vadd.f32 %v914_v34, %v868_v37 }
0x19a9   :  { %878 = vrot.lane.b32.xlu0 %v869_v3, %s961_s29 }
0x1a1b   :  { %v879_v40 = vpop.permute.xlu0 %878 }
0x1a1c   :  { %882 = vst.msk [vmem:[%s1476_s7] sm:$0xff] %vm881_vm3, %v879_v40 }
0x1a1d   :  { %884 = vst.msk [vmem:[%s1476_s7] sm:$0xff] %vm883_vm4, %v962_v5 }

</bundles_post_ra>
